<compile_context>
chip_gen: v6e
topology: v6e:2x2x1
jax: 0.10.0
libtpu: 0.0.40
codegen_flags: <defaults>
</compile_context>

<pallas_src>
import functools

import jax
import jax.numpy as jnp
from jax.experimental import pallas as pl
from jax.experimental.pallas import tpu as pltpu

_MIB = 1024 * 1024


# ----------------------------------------------------------------------------
# Hardware-aware sizing helpers
# ----------------------------------------------------------------------------
def _vmem_capacity_bytes():
    try:
        return pltpu.get_tpu_info().vmem_capacity_bytes
    except Exception:
        return 64 * _MIB  # conservative (v7x per-TC VMEM)


def _vmem_limit_bytes():
    cap = _vmem_capacity_bytes()
    if cap >= 96 * _MIB:      # v5e / v6e: 128 MiB physical
        return 96 * _MIB
    return 48 * _MIB          # v7x: 64 MiB physical


def _compiler_params(dimension_semantics):
    return pltpu.CompilerParams(
        dimension_semantics=dimension_semantics,
        vmem_limit_bytes=int(_vmem_limit_bytes()),
    )


def _round_up(x, m):
    return ((x + m - 1) // m) * m


def _to_bf16(x):
    """Safe cast to bf16 (int8 goes via f32 so Mosaic lowering is guaranteed)."""
    if x.dtype == jnp.bfloat16:
        return x
    if x.dtype == jnp.float32:
        return x.astype(jnp.bfloat16)
    return x.astype(jnp.float32).astype(jnp.bfloat16)


def _stage_vmem_bytes(n, d):
    a = 2 * n * n * 2               # bf16 A, double-buffered by the pipeline
    acts = 4 * n * d * 4            # x in + out blocks (double-buffered)
    scratch = 2 * n * d * 4         # h / skip scratch
    temps = 8 * n * d * 4           # matmul / epilogue temporaries
    return a + acts + scratch + temps + 2 * _MIB


def _layer_resident_vmem_bytes(tm, n_pad, d, a_itemsize):
    a_bufs = 2 * tm * n_pad * a_itemsize
    a_cast = tm * n_pad * 6 if a_itemsize == 1 else 0   # i8 -> f32 -> bf16 temps
    xw = 2 * n_pad * d * 2                               # resident XW (bf16)
    rows = 8 * tm * d * 4                                # out / skip + epilogue temps
    return a_bufs + a_cast + xw + rows + 2 * _MIB


def _choose_resident_row_tile(n_pad, d, a_itemsize, budget):
    candidates = [t for t in (1024, 512, 256, 128) if n_pad % t == 0]
    # First pass insists on >= 2 row tiles so both v7x TensorCores get work.
    for require_two in (True, False):
        for t in candidates:
            if require_two and n_pad // t < 2:
                continue
            if _layer_resident_vmem_bytes(t, n_pad, d, a_itemsize) <= budget:
                return t
    return None


def _choose_ktiled_tiles(n_pad):
    tm = 128
    for t in (512, 256, 128):
        if n_pad % t == 0 and n_pad // t >= 2:
            tm = t
            break
    tk = 512 if n_pad % 512 == 0 else 256
    return tm, tk


def _quantize_adjacency(a):
    """int8 symmetric quantization with one global scale (folded into W)."""
    a = jnp.asarray(a, jnp.float32)
    scale = jnp.maximum(jnp.max(jnp.abs(a)), jnp.float32(1e-20)) / 127.0
    q = jnp.clip(jnp.round(a / scale), -127.0, 127.0).astype(jnp.int8)
    return q, scale


# ----------------------------------------------------------------------------
# Stage-resident kernel: whole skip stage in one pallas_call, grid over layers.
# A, x, output and the activation scratch stay VMEM-resident; A is read from
# HBM exactly once for the whole stage.
# ----------------------------------------------------------------------------
def _stage_kernel(x_ref, a_ref, w_ref, b_ref, o_ref, h_scr, skip_scr, *,
                  skip_every, num_layers, l2norm):
    l = pl.program_id(0)

    @pl.when(l == 0)
    def _init():
        h_scr[...] = x_ref[...].astype(jnp.float32)
        skip_scr[...] = h_scr[...]

    # One GCN layer: y = A @ (h @ W_l) + b_l    (bf16 MXU, f32 accumulate)
    xw = jnp.dot(_to_bf16(h_scr[...]), w_ref[0],
                 preferred_element_type=jnp.float32)
    y = jnp.dot(a_ref[...], _to_bf16(xw),
                preferred_element_type=jnp.float32) + b_ref[0]

    block_end = (l % skip_every) == (skip_every - 1)

    @pl.when(jnp.logical_not(block_end))
    def _inner_layer():
        h_scr[...] = jnp.maximum(y, 0.0)              # ReLU (inner layer)

    @pl.when(block_end)
    def _block_boundary():
        z = jnp.maximum(y + skip_scr[...], 0.0)       # skipsum + block ReLU
        h_scr[...] = z
        skip_scr[...] = z                             # new skip for next block

    @pl.when(l == num_layers - 1)
    def _finalize():
        out = h_scr[...]
        if l2norm:                                    # F.normalize(p=2, dim=-1)
            nrm = jnp.sqrt(jnp.sum(out * out, axis=-1, keepdims=True))
            out = out / jnp.maximum(nrm, 1e-12)
        o_ref[...] = out.astype(o_ref.dtype)


def _stage_forward(x, a_bf16, w_stack, b_stack, *, skip_every, l2norm):
    n, d = x.shape
    num_layers = w_stack.shape[0]
    kernel = functools.partial(_stage_kernel, skip_every=skip_every,
                               num_layers=num_layers, l2norm=l2norm)
    return pl.pallas_call(
        kernel,
        out_shape=jax.ShapeDtypeStruct((n, d), jnp.float32),
        grid_spec=pltpu.PrefetchScalarGridSpec(
            num_scalar_prefetch=0,
            grid=(num_layers,),
            in_specs=[
                pl.BlockSpec((n, d), lambda l: (0, 0)),        # x (resident)
                pl.BlockSpec((n, n), lambda l: (0, 0)),        # A bf16 (resident)
                pl.BlockSpec((1, d, d), lambda l: (l, 0, 0)),  # W_l (bf16)
                pl.BlockSpec((1, 1, d), lambda l: (l, 0, 0)),  # b_l (f32)
            ],
            out_specs=pl.BlockSpec((n, d), lambda l: (0, 0)),  # resident output
            scratch_shapes=[pltpu.VMEM((n, d), jnp.float32),   # h
                            pltpu.VMEM((n, d), jnp.float32)],  # skip
        ),
        compiler_params=_compiler_params(("arbitrary",)),
    )(x, a_bf16, w_stack, b_stack)


# ----------------------------------------------------------------------------
# Per-layer kernel 1: XW = X @ W   (W pre-cast bf16 + VMEM-resident)
# ----------------------------------------------------------------------------
def _xw_kernel(x_ref, w_ref, o_ref):
    o_ref[...] = jnp.dot(_to_bf16(x_ref[...]), w_ref[...],
                         preferred_element_type=jnp.float32).astype(o_ref.dtype)


def _xw_matmul(h, w_bf16, *, tm):
    n_pad, d_in = h.shape
    d_out = w_bf16.shape[1]
    return pl.pallas_call(
        _xw_kernel,
        out_shape=jax.ShapeDtypeStruct((n_pad, d_out), jnp.bfloat16),
        grid_spec=pltpu.PrefetchScalarGridSpec(
            num_scalar_prefetch=0,
            grid=(n_pad // tm,),
            in_specs=[
                pl.BlockSpec((tm, d_in), lambda i: (i, 0)),
                pl.BlockSpec((d_in, d_out), lambda i: (0, 0)),   # W resident
            ],
            out_specs=pl.BlockSpec((tm, d_out), lambda i: (i, 0)),
        ),
        compiler_params=_compiler_params(("parallel",)),
    )(h, w_bf16)


# ----------------------------------------------------------------------------
# Per-layer kernel 2a: H = A @ XW with XW fully VMEM-resident (row-tile grid)
# bias / skip / ReLU / L2-norm fused into the epilogue.
# ----------------------------------------------------------------------------
def _agg_resident_kernel(a_ref, xw_ref, b_ref, *rest, add_skip, apply_relu,
                         apply_l2norm):
    if add_skip:
        skip_ref, o_ref = rest
    else:
        (o_ref,) = rest
        skip_ref = None

    y = jnp.dot(_to_bf16(a_ref[...]), xw_ref[...],
                preferred_element_type=jnp.float32)
    y = y + b_ref[...]
    if add_skip:
        y = y + skip_ref[...]
    if apply_relu:
        y = jnp.maximum(y, 0.0)
    if apply_l2norm:
        nrm = jnp.sqrt(jnp.sum(y * y, axis=-1, keepdims=True))
        y = y / jnp.maximum(nrm, 1e-12)
    o_ref[...] = y.astype(o_ref.dtype)


def _aggregate_resident(a_stream, xw, bias, skip, *, apply_relu, apply_l2norm,
                        tm):
    n_pad = a_stream.shape[0]
    d = xw.shape[1]
    add_skip = skip is not None
    kernel = functools.partial(_agg_resident_kernel, add_skip=add_skip,
                               apply_relu=apply_relu, apply_l2norm=apply_l2norm)
    in_specs = [
        pl.BlockSpec((tm, n_pad), lambda i: (i, 0)),   # A row panel (int8/bf16)
        pl.BlockSpec((n_pad, d), lambda i: (0, 0)),    # XW resident (bf16)
        pl.BlockSpec((1, d), lambda i: (0, 0)),        # bias (f32, resident)
    ]
    args = [a_stream, xw, bias]
    if add_skip:
        in_specs.append(pl.BlockSpec((tm, d), lambda i: (i, 0)))  # skip (f32)
        args.append(skip)
    return pl.pallas_call(
        kernel,
        out_shape=jax.ShapeDtypeStruct((n_pad, d), jnp.float32),
        grid_spec=pltpu.PrefetchScalarGridSpec(
            num_scalar_prefetch=0,
            grid=(n_pad // tm,),
            in_specs=in_specs,
            out_specs=pl.BlockSpec((tm, d), lambda i: (i, 0)),
        ),
        compiler_params=_compiler_params(("parallel",)),
    )(*args)


# ----------------------------------------------------------------------------
# Per-layer kernel 2b: k-tiled fallback (XW streamed); accumulates directly
# into the resident output block (no separate scratch accumulator).
# ----------------------------------------------------------------------------
def _agg_ktiled_kernel(a_ref, xw_ref, b_ref, *rest, add_skip, apply_relu,
                       apply_l2norm):
    if add_skip:
        skip_ref, o_ref = rest
    else:
        (o_ref,) = rest
        skip_ref = None

    k = pl.program_id(1)

    @pl.when(k == 0)
    def _init():
        o_ref[...] = jnp.zeros_like(o_ref)

    o_ref[...] += jnp.dot(_to_bf16(a_ref[...]), xw_ref[...],
                          preferred_element_type=jnp.float32)

    @pl.when(k == pl.num_programs(1) - 1)
    def _epilogue():
        y = o_ref[...] + b_ref[...]
        if add_skip:
            y = y + skip_ref[...]
        if apply_relu:
            y = jnp.maximum(y, 0.0)
        if apply_l2norm:
            nrm = jnp.sqrt(jnp.sum(y * y, axis=-1, keepdims=True))
            y = y / jnp.maximum(nrm, 1e-12)
        o_ref[...] = y


def _aggregate_ktiled(a_stream, xw, bias, skip, *, apply_relu, apply_l2norm,
                      tm, tk):
    n_pad = a_stream.shape[0]
    d = xw.shape[1]
    add_skip = skip is not None
    kernel = functools.partial(_agg_ktiled_kernel, add_skip=add_skip,
                               apply_relu=apply_relu, apply_l2norm=apply_l2norm)
    in_specs = [
        pl.BlockSpec((tm, tk), lambda i, k: (i, k)),   # A tile
        pl.BlockSpec((tk, d), lambda i, k: (k, 0)),    # XW tile (bf16)
        pl.BlockSpec((1, d), lambda i, k: (0, 0)),     # bias
    ]
    args = [a_stream, xw, bias]
    if add_skip:
        in_specs.append(pl.BlockSpec((tm, d), lambda i, k: (i, 0)))
        args.append(skip)
    return pl.pallas_call(
        kernel,
        out_shape=jax.ShapeDtypeStruct((n_pad, d), jnp.float32),
        grid_spec=pltpu.PrefetchScalarGridSpec(
            num_scalar_prefetch=0,
            grid=(n_pad // tm, n_pad // tk),           # reduction axis last
            in_specs=in_specs,
            out_specs=pl.BlockSpec((tm, d), lambda i, k: (i, 0)),
        ),
        compiler_params=_compiler_params(("parallel", "arbitrary")),
    )(*args)


def _per_layer_forward(feat, a_stream, ws, bs, *, skip_every, l2norm, resident,
                       tm, tk):
    num_blocks = len(ws) // skip_every
    li = 0

    def agg(xw, b, skip, relu, l2):
        if resident:
            return _aggregate_resident(a_stream, xw, b, skip, apply_relu=relu,
                                       apply_l2norm=l2, tm=tm)
        return _aggregate_ktiled(a_stream, xw, b, skip, apply_relu=relu,
                                 apply_l2norm=l2, tm=tm, tk=tk)

    for blk in range(num_blocks):
        skip = feat
        h = feat
        for _ in range(skip_every - 1):        # inner layers: ReLU(A(hW)+b)
            xw = _xw_matmul(h, ws[li], tm=tm)
            h = agg(xw, bs[li], None, True, False)
            li += 1
        xw = _xw_matmul(h, ws[li], tm=tm)      # block end: skipsum + ReLU (+L2)
        last_block = blk == num_blocks - 1
        feat = agg(xw, bs[li], skip, True, l2norm and last_block)
        li += 1
    return feat


# ----------------------------------------------------------------------------
# GNNSkipStage forward (skipsum, ReLU, final L2 norm)
# ----------------------------------------------------------------------------
def gnn_skip_stage_forward(x, a_norm, params, *, skip_every=2, l2norm=True,
                           quantize_adjacency=True, mode="auto"):
    n, d = x.shape
    num_layers = len(params)
    assert a_norm.shape == (n, n)
    assert num_layers % skip_every == 0, "num_layers must be multiple of skip_every"
    for w, b in params:
        assert w.shape == (d, d)   # skipsum requires dim_in == dim_out

    # 8-bit adjacency stream; the global scale is folded into the weights.
    if quantize_adjacency:
        a_q, scale = _quantize_adjacency(a_norm)
        a_item = 1
    else:
        a_q, scale = a_norm, jnp.float32(1.0)
        a_item = 2

    ws = [(jnp.asarray(w, jnp.float32) * scale).astype(jnp.bfloat16)
          for w, _ in params]
    bs = [jnp.asarray(b, jnp.float32).reshape(1, d) for _, b in params]

    limit = _vmem_limit_bytes()

    if mode == "auto":
        mode = "stage" if _stage_vmem_bytes(n, d) <= int(0.9 * limit) \
            else "layer_resident"

    if mode == "stage":
        # A held in VMEM as bf16 (quantized integers are exact in bf16) for the
        # whole stage -> A is read from HBM exactly once.
        a_bf16 = a_q.astype(jnp.bfloat16)
        w_stack = jnp.stack(ws)            # (L, d, d) bf16
        b_stack = jnp.stack(bs)            # (L, 1, d) f32
        return _stage_forward(x.astype(jnp.float32), a_bf16, w_stack, b_stack,
                              skip_every=skip_every, l2norm=l2norm)

    # ---- per-layer path: pad rows to a multiple of 256 so tiles divide ----
    n_pad = _round_up(n, 256)
    a_stream = a_q if quantize_adjacency else a_q.astype(jnp.bfloat16)
    feat = x.astype(jnp.float32)
    if n_pad != n:
        pad = n_pad - n
        a_stream = jnp.pad(a_stream, ((0, pad), (0, pad)))
        feat = jnp.pad(feat, ((0, pad), (0, 0)))

    tm = None
    tk = None
    if mode == "layer_resident":
        tm = _choose_resident_row_tile(n_pad, d, a_item, int(0.9 * limit))
        if tm is None:
            mode = "layer_ktiled"
    if mode == "layer_ktiled":
        tm, tk = _choose_ktiled_tiles(n_pad)

    out = _per_layer_forward(feat, a_stream, ws, bs, skip_every=skip_every,
                             l2norm=l2norm, resident=(mode == "layer_resident"),
                             tm=tm, tk=tk)
    return out[:n]


# ----------------------------------------------------------------------------
# Pure-JAX reference (same math, f32)
# ----------------------------------------------------------------------------
def _reference_forward(x, a, params, *, skip_every=2, l2norm=True):
    feat = x.astype(jnp.float32)
    num_blocks = len(params) // skip_every
    li = 0
    for _ in range(num_blocks):
        skip = feat
        h = feat
        for _ in range(skip_every - 1):
            w, b = params[li]
            li += 1
            h = jax.nn.relu(a @ (h @ w) + b)
        w, b = params[li]
        li += 1
        h = a @ (h @ w) + b
        feat = jax.nn.relu(skip + h)
    if l2norm:
        nrm = jnp.sqrt(jnp.sum(feat * feat, axis=-1, keepdims=True))
        feat = feat / jnp.maximum(nrm, 1e-12)
    return feat


if __name__ == "__main__":
    key = jax.random.PRNGKey(0)
    n_nodes, dim = 256, 128          # skipsum requires dim_in == dim_out
    num_layers = 4                   # 2 skip blocks with skip_every = 2
    skip_every = 2

    k_x, k_a, k_w = jax.random.split(key, 3)

    # Node features.
    x = jax.random.normal(k_x, (n_nodes, dim), dtype=jnp.float32)

    # Random symmetric adjacency with self loops + GCN normalization
    # A_norm = D^{-1/2} (A + I) D^{-1/2}   (preprocessing, plain JAX glue).
    rand = jax.random.uniform(k_a, (n_nodes, n_nodes))
    adj = (rand < 0.05).astype(jnp.float32)
    adj = jnp.maximum(adj, adj.T)
    adj = jnp.minimum(adj + jnp.eye(n_nodes, dtype=jnp.float32), 1.0)
    deg_inv_sqrt = jax.lax.rsqrt(jnp.sum(adj, axis=1))
    a_norm = adj * deg_inv_sqrt[:, None] * deg_inv_sqrt[None, :]

    # Layer parameters (W: [D, D], bias: [1, D]).
    params = []
    wkeys = jax.random.split(k_w, 2 * num_layers)
    for l in range(num_layers):
        w = jax.random.normal(wkeys[2 * l], (dim, dim), jnp.float32) / jnp.sqrt(
            jnp.float32(dim))
        b = 0.01 * jax.random.normal(wkeys[2 * l + 1], (1, dim), jnp.float32)
        params.append((w, b))

    # Reference uses the same int8-quantized adjacency the kernels stream.
    a_q, scale = _quantize_adjacency(a_norm)
    a_deq = a_q.astype(jnp.float32) * scale
    ref = _reference_forward(x, a_deq, params, skip_every=skip_every,
                             l2norm=True)

    # Exercise every code path on device: "auto" resolves to the stage-resident
    # kernel at this size; the two per-layer paths are forced explicitly.
    for mode in ("auto", "layer_resident", "layer_ktiled"):
        fwd = jax.jit(functools.partial(
            gnn_skip_stage_forward, skip_every=skip_every, l2norm=True,
            quantize_adjacency=True, mode=mode))
        out = jax.block_until_ready(fwd(x, a_norm, params))
        assert out.shape == (n_nodes, dim)
        max_err = float(jnp.max(jnp.abs(out - ref)))
        assert max_err < 5e-2, f"mode={mode}: max abs error too large: {max_err}"
    print("KERNEL_OK")
</pallas_src>

<mosaic_0001>
module attributes {stable_mosaic.version = 11 : i64} {
  func.func @_stage_kernel(%arg0: i32, %arg1: memref<256x128xf32, #tpu.memory_space<vmem>>, %arg2: memref<256x256xbf16, #tpu.memory_space<vmem>>, %arg3: memref<1x128x128xbf16, #tpu.memory_space<vmem>>, %arg4: memref<1x1x128xf32, #tpu.memory_space<vmem>>, %arg5: memref<256x128xf32, #tpu.memory_space<vmem>>, %arg6: memref<256x128xf32, #tpu.memory_space<vmem>>, %arg7: memref<256x128xf32, #tpu.memory_space<vmem>>) attributes {dimension_semantics = [#tpu.dimension_semantics<arbitrary>], iteration_bounds = array<i64: 4>, scalar_prefetch = 0 : i64, scratch_operands = 2 : i64, tpu.core_type = #tpu.core_type<tc>, window_params = [{pipeline_mode = #tpu.pipeline_mode<synchronous>, transform_indices = @transform_0, window_bounds = array<i64: 256, 128>}, {pipeline_mode = #tpu.pipeline_mode<synchronous>, transform_indices = @transform_1, window_bounds = array<i64: 256, 256>}, {transform_indices = @transform_2, window_bounds = array<i64: 1, 128, 128>}, {transform_indices = @transform_3, window_bounds = array<i64: 1, 1, 128>}, {pipeline_mode = #tpu.pipeline_mode<synchronous>, transform_indices = @transform_4, window_bounds = array<i64: 256, 128>}]} {
    %c0_i32 = arith.constant 0 : i32
    %0 = arith.cmpi eq, %arg0, %c0_i32 : i32
    %1 = arith.extui %0 : i1 to i32
    %c0_i32_0 = arith.constant 0 : i32
    %2 = arith.cmpi ne, %1, %c0_i32_0 : i32
    scf.if %2 {
      %c0_19 = arith.constant 0 : index
      %c0_20 = arith.constant 0 : index
      %34 = vector.load %arg1[%c0_19, %c0_20] : memref<256x128xf32, #tpu.memory_space<vmem>>, vector<256x128xf32>
      %c0_21 = arith.constant 0 : index
      %c0_22 = arith.constant 0 : index
      %35 = vector.load %arg6[%c0_21, %c0_22] : memref<256x128xf32, #tpu.memory_space<vmem>>, vector<256x128xf32>
      tpu.vector_store %arg6[%c0_21, %c0_22], %34 {strides = array<i32>} : memref<256x128xf32, #tpu.memory_space<vmem>>, vector<256x128xf32>,
      %c0_23 = arith.constant 0 : index
      %c0_24 = arith.constant 0 : index
      %36 = vector.load %arg6[%c0_23, %c0_24] : memref<256x128xf32, #tpu.memory_space<vmem>>, vector<256x128xf32>
      %c0_25 = arith.constant 0 : index
      %c0_26 = arith.constant 0 : index
      %37 = vector.load %arg7[%c0_25, %c0_26] : memref<256x128xf32, #tpu.memory_space<vmem>>, vector<256x128xf32>
      tpu.vector_store %arg7[%c0_25, %c0_26], %36 {strides = array<i32>} : memref<256x128xf32, #tpu.memory_space<vmem>>, vector<256x128xf32>,
    } else {
    }
    %c0 = arith.constant 0 : index
    %c0_1 = arith.constant 0 : index
    %3 = vector.load %arg6[%c0, %c0_1] : memref<256x128xf32, #tpu.memory_space<vmem>>, vector<256x128xf32>
    %4 = arith.truncf %3 : vector<256x128xf32> to vector<256x128xbf16>
    %c0_2 = arith.constant 0 : index
    %c0_3 = arith.constant 0 : index
    %c0_4 = arith.constant 0 : index
    %5 = vector.load %arg3[%c0_2, %c0_3, %c0_4] : memref<1x128x128xbf16, #tpu.memory_space<vmem>>, vector<1x128x128xbf16>
    %6 = vector.shape_cast %5 : vector<1x128x128xbf16> to vector<128x128xbf16>
    %cst = arith.constant dense<0.000000e+00> : vector<256x128xf32>
    %7 = tpu.matmul %4, %6, %cst {dimension_numbers = #tpu.dot_dimension_numbers<[1], [0], [0], [1], [0, 0, 1, 1], [], []>} : vector<256x128xbf16>, vector<128x128xbf16>, vector<256x128xf32> -> vector<256x128xf32>
    %c0_5 = arith.constant 0 : index
    %c0_6 = arith.constant 0 : index
    %8 = vector.load %arg2[%c0_5, %c0_6] : memref<256x256xbf16, #tpu.memory_space<vmem>>, vector<256x256xbf16>
    %9 = arith.truncf %7 : vector<256x128xf32> to vector<256x128xbf16>
    %cst_7 = arith.constant dense<0.000000e+00> : vector<256x128xf32>
    %10 = tpu.matmul %8, %9, %cst_7 {dimension_numbers = #tpu.dot_dimension_numbers<[1], [0], [0], [1], [0, 0, 1, 1], [], []>} : vector<256x256xbf16>, vector<256x128xbf16>, vector<256x128xf32> -> vector<256x128xf32>
    %c0_8 = arith.constant 0 : index
    %c0_9 = arith.constant 0 : index
    %c0_10 = arith.constant 0 : index
    %11 = vector.load %arg4[%c0_8, %c0_9, %c0_10] : memref<1x1x128xf32, #tpu.memory_space<vmem>>, vector<1x1x128xf32>
    %12 = vector.shape_cast %11 : vector<1x1x128xf32> to vector<1x128xf32>
    %13 = vector.broadcast %12 : vector<1x128xf32> to vector<256x128xf32>
    %14 = arith.addf %10, %13 : vector<256x128xf32>
    %c2_i32 = arith.constant 2 : i32
    %c0_i32_11 = arith.constant 0 : i32
    %15 = arith.cmpi eq, %c2_i32, %c0_i32_11 : i32
    %c1_i32 = arith.constant 1 : i32
    %16 = arith.select %15, %c1_i32, %c2_i32 : i32
    %17 = arith.remsi %arg0, %16 : i32
    %c0_i32_12 = arith.constant 0 : i32
    %18 = arith.cmpi ne, %17, %c0_i32_12 : i32
    %c0_i32_13 = arith.constant 0 : i32
    %19 = arith.cmpi slt, %17, %c0_i32_13 : i32
    %c0_i32_14 = arith.constant 0 : i32
    %20 = arith.cmpi slt, %16, %c0_i32_14 : i32
    %21 = arith.xori %19, %20 : i1
    %22 = arith.andi %21, %18 : i1
    %23 = arith.addi %17, %16 : i32
    %24 = arith.select %22, %23, %17 : i32
    %c1_i32_15 = arith.constant 1 : i32
    %25 = arith.cmpi eq, %24, %c1_i32_15 : i32
    %true = arith.constant true
    %26 = arith.xori %25, %true : i1
    %27 = arith.extui %26 : i1 to i32
    %c0_i32_16 = arith.constant 0 : i32
    %28 = arith.cmpi ne, %27, %c0_i32_16 : i32
    scf.if %28 {
      %cst_19 = arith.constant 0.000000e+00 : f32
      %34 = vector.broadcast %cst_19 : f32 to vector<256x128xf32>
      %35 = arith.maximumf %14, %34 : vector<256x128xf32>
      %c0_20 = arith.constant 0 : index
      %c0_21 = arith.constant 0 : index
      %36 = vector.load %arg6[%c0_20, %c0_21] : memref<256x128xf32, #tpu.memory_space<vmem>>, vector<256x128xf32>
      tpu.vector_store %arg6[%c0_20, %c0_21], %35 {strides = array<i32>} : memref<256x128xf32, #tpu.memory_space<vmem>>, vector<256x128xf32>,
    } else {
    }
    %29 = arith.extui %25 : i1 to i32
    %c0_i32_17 = arith.constant 0 : i32
    %30 = arith.cmpi ne, %29, %c0_i32_17 : i32
    scf.if %30 {
      %c0_19 = arith.constant 0 : index
      %c0_20 = arith.constant 0 : index
      %34 = vector.load %arg7[%c0_19, %c0_20] : memref<256x128xf32, #tpu.memory_space<vmem>>, vector<256x128xf32>
      %35 = arith.addf %14, %34 : vector<256x128xf32>
      %cst_21 = arith.constant 0.000000e+00 : f32
      %36 = vector.broadcast %cst_21 : f32 to vector<256x128xf32>
      %37 = arith.maximumf %35, %36 : vector<256x128xf32>
      %c0_22 = arith.constant 0 : index
      %c0_23 = arith.constant 0 : index
      %38 = vector.load %arg6[%c0_22, %c0_23] : memref<256x128xf32, #tpu.memory_space<vmem>>, vector<256x128xf32>
      tpu.vector_store %arg6[%c0_22, %c0_23], %37 {strides = array<i32>} : memref<256x128xf32, #tpu.memory_space<vmem>>, vector<256x128xf32>,
      %c0_24 = arith.constant 0 : index
      %c0_25 = arith.constant 0 : index
      %39 = vector.load %arg7[%c0_24, %c0_25] : memref<256x128xf32, #tpu.memory_space<vmem>>, vector<256x128xf32>
      tpu.vector_store %arg7[%c0_24, %c0_25], %37 {strides = array<i32>} : memref<256x128xf32, #tpu.memory_space<vmem>>, vector<256x128xf32>,
    } else {
    }
    %c3_i32 = arith.constant 3 : i32
    %31 = arith.cmpi eq, %arg0, %c3_i32 : i32
    %32 = arith.extui %31 : i1 to i32
    %c0_i32_18 = arith.constant 0 : i32
    %33 = arith.cmpi ne, %32, %c0_i32_18 : i32
    scf.if %33 {
      %c0_19 = arith.constant 0 : index
      %c0_20 = arith.constant 0 : index
      %34 = vector.load %arg6[%c0_19, %c0_20] : memref<256x128xf32, #tpu.memory_space<vmem>>, vector<256x128xf32>
      %35 = arith.mulf %34, %34 : vector<256x128xf32>
      %cst_21 = arith.constant dense<0.000000e+00> : vector<256xf32>
      %36 = vector.multi_reduction <add>, %35, %cst_21 [1] : vector<256x128xf32> to vector<256xf32>
      %37 = vector.shape_cast %36 : vector<256xf32> to vector<256x1xf32>
      %38 = math.sqrt %37 : vector<256x1xf32>
      %cst_22 = arith.constant 9.99999996E-13 : f32
      %39 = vector.broadcast %cst_22 : f32 to vector<256x1xf32>
      %40 = arith.maximumf %38, %39 : vector<256x1xf32>
      %41 = vector.broadcast %40 : vector<256x1xf32> to vector<256x128xf32>
      %42 = arith.divf %34, %41 : vector<256x128xf32>
      %c0_23 = arith.constant 0 : index
      %c0_24 = arith.constant 0 : index
      %43 = vector.load %arg5[%c0_23, %c0_24] : memref<256x128xf32, #tpu.memory_space<vmem>>, vector<256x128xf32>
      tpu.vector_store %arg5[%c0_23, %c0_24], %42 {strides = array<i32>} : memref<256x128xf32, #tpu.memory_space<vmem>>, vector<256x128xf32>,
    } else {
    }
    return
  }
  func.func @transform_0(%arg0: i32) -> (i32, i32) {
    %c0_i32 = arith.constant 0 : i32
    %c0_i32_0 = arith.constant 0 : i32
    %c0_i32_1 = arith.constant 0 : i32
    return %c0_i32, %c0_i32_0 : i32, i32
  }
  func.func @transform_1(%arg0: i32) -> (i32, i32) {
    %c0_i32 = arith.constant 0 : i32
    %c0_i32_0 = arith.constant 0 : i32
    %c0_i32_1 = arith.constant 0 : i32
    return %c0_i32, %c0_i32_0 : i32, i32
  }
  func.func @transform_2(%arg0: i32) -> (i32, i32, i32) {
    %c0_i32 = arith.constant 0 : i32
    %c0_i32_0 = arith.constant 0 : i32
    %c0_i32_1 = arith.constant 0 : i32
    return %arg0, %c0_i32, %c0_i32_0 : i32, i32, i32
  }
  func.func @transform_3(%arg0: i32) -> (i32, i32, i32) {
    %c0_i32 = arith.constant 0 : i32
    %c0_i32_0 = arith.constant 0 : i32
    %c0_i32_1 = arith.constant 0 : i32
    return %arg0, %c0_i32, %c0_i32_0 : i32, i32, i32
  }
  func.func @transform_4(%arg0: i32) -> (i32, i32) {
    %c0_i32 = arith.constant 0 : i32
    %c0_i32_0 = arith.constant 0 : i32
    %c0_i32_1 = arith.constant 0 : i32
    return %c0_i32, %c0_i32_0 : i32, i32
  }
}

</mosaic_0001>

<bundles_post_ra>
// kernel: gnn_skip_stage_forward.1
= control target key start
LH: loop header
LB: loop body
LE: loop exit
PB: predicated region body
PF: predicated region fallthrough
CT: control target
= control target key end

     0   :  { %9 = vsyncpa [#allocation5], 0  ;;  %s2289_s15 = smov 0   ;;  %s3156_s0 = inlined_call_operand.vmem [shape: f32[256,128], index: 0, kind: input, shape index: {}]   ;;  %s3157_s1 = inlined_call_operand.vmem [shape: bf16[256,256], index: 1, kind: input, shape index: {}]   ;;  %s3158_s2 = inlined_call_operand.vmem [shape: bf16[4,128,128], index: 2, kind: input, shape index: {}]   ;;  %s3159_s3 = inlined_call_operand.vmem [shape: f32[4,1,128], index: 3, kind: input, shape index: {}]   ;;  %s3160_s4 = inlined_call_operand.hbm [shape: f32[256,128], index: 4, kind: output, shape index: {}]  }
   0x1 LB: > { %s2295_s16 = sadd.s32 4294967295, %s2259_s15   ;;  %p1768_p0 = scmp.ge.s32.totalorder %s2259_s15, 1  ;;  %s2259_s15 = sphi %s2289_s15, %s15_s15  }
   0x2   : > { %p166_p1 = scmp.lt.s32.totalorder %s2259_s15, 5 }
   0x4   : > { %p167_p2 = pnand %p1768_p0, %p166_p1 }
   0x5   : > { %p190_p3 = scmp.lt.s32.totalorder (!%p167_p2), %s2295_s16, 3  ;;  %p1771_p4 = scmp.ne.s32.totalorder (!%p167_p2), %s2295_s16, 0 }
   0x6   : > { %170 = sbr.rel (%p167_p2) target bundleno = 997 (0x3e5), region = 36 }
   0xb   : > { %s2301_s17 = scalar_select %p190_p3, %s2295_s16, 3 }
   0xc   : > { %202 = sbr.rel (%p1771_p4) target bundleno = 50 (0x32), region = 40 }
   0xd   : > { %s1823_s18 = sshll.u32 %s2301_s17, 6  ;;  %s197_s21 = scalar_lea.vmem %s3159_s3, %s2301_s17 }
   0xe   : > { %s2311_s24 = scalar_lea.vmem %s3158_s2, %s1823_s18 }
  0x11   : > { %v203_v0 = vld [vmem:[%s3156_s0] sm:$0xff]  ;;  %v204_v1 = vld [vmem:[%s3156_s0 + $0x8] sm:$0xff]  ;;  %v205_v2 = vld [vmem:[%s3156_s0 + $0x10] sm:$0xff] }
  0x12   : > { %235 = vst [vmem:[#allocation2 + $0xb0] sm:$0xff] %v203_v0  ;;  %236 = vst [vmem:[#allocation2] sm:$0xff] %v204_v1  ;;  %v206_v3 = vld [vmem:[%s3156_s0 + $0x18] sm:$0xff]  ;;  %v207_v4 = vld [vmem:[%s3156_s0 + $0x20] sm:$0xff] }
  0x13   : > { %237 = vst [vmem:[#allocation2 + $0xd8] sm:$0xff] %v205_v2  ;;  %v208_v5 = vld [vmem:[%s3156_s0 + $0x28] sm:$0xff]  ;;  %299 = vst [vmem:[#allocation3 + $0x80] sm:$0xff] %v203_v0  ;;  %v209_v6 = vld [vmem:[%s3156_s0 + $0x30] sm:$0xff] }
  0x14   : > { %300 = vst [vmem:[#allocation3 + $0xc8] sm:$0xff] %v204_v1  ;;  %301 = vst [vmem:[#allocation3 + $0xe8] sm:$0xff] %v205_v2  ;;  %v210_v7 = vld [vmem:[%s3156_s0 + $0x38] sm:$0xff]  ;;  %v211_v8 = vld [vmem:[%s3156_s0 + $0x40] sm:$0xff] }
  0x15   : > { %238 = vst [vmem:[#allocation2 + $0x18] sm:$0xff] %v206_v3  ;;  %239 = vst [vmem:[#allocation2 + $0x50] sm:$0xff] %v207_v4  ;;  %v212_v9 = vld [vmem:[%s3156_s0 + $0x48] sm:$0xff]  ;;  %v213_v10 = vld [vmem:[%s3156_s0 + $0x50] sm:$0xff] }
  0x16   : > { %240 = vst [vmem:[#allocation2 + $0x68] sm:$0xff] %v208_v5  ;;  %302 = vst [vmem:[#allocation3 + $0x78] sm:$0xff] %v206_v3  ;;  %v214_v11 = vld [vmem:[%s3156_s0 + $0x58] sm:$0xff]  ;;  %v215_v12 = vld [vmem:[%s3156_s0 + $0x60] sm:$0xff] }
  0x17   : > { %303 = vst [vmem:[#allocation3 + $0x8] sm:$0xff] %v207_v4  ;;  %304 = vst [vmem:[#allocation3 + $0x90] sm:$0xff] %v208_v5  ;;  %v216_v13 = vld [vmem:[%s3156_s0 + $0x68] sm:$0xff]  ;;  %v217_v14 = vld [vmem:[%s3156_s0 + $0x70] sm:$0xff] }
  0x18   : > { %241 = vst [vmem:[#allocation2 + $0x30] sm:$0xff] %v209_v6  ;;  %242 = vst [vmem:[#allocation2 + $0x48] sm:$0xff] %v210_v7  ;;  %v218_v15 = vld [vmem:[%s3156_s0 + $0x78] sm:$0xff]  ;;  %v219_v16 = vld [vmem:[%s3156_s0 + $0x80] sm:$0xff] }
  0x19   : > { %243 = vst [vmem:[#allocation2 + $0x80] sm:$0xff] %v211_v8  ;;  %305 = vst [vmem:[#allocation3 + $0x58] sm:$0xff] %v209_v6  ;;  %v220_v17 = vld [vmem:[%s3156_s0 + $0x88] sm:$0xff]  ;;  %v221_v18 = vld [vmem:[%s3156_s0 + $0x90] sm:$0xff] }
  0x1a   : > { %306 = vst [vmem:[#allocation3 + $0xa8] sm:$0xff] %v210_v7  ;;  %307 = vst [vmem:[#allocation3 + $0xd0] sm:$0xff] %v211_v8  ;;  %v222_v19 = vld [vmem:[%s3156_s0 + $0x98] sm:$0xff]  ;;  %v223_v20 = vld [vmem:[%s3156_s0 + $0xa0] sm:$0xff] }
  0x1b   : > { %244 = vst [vmem:[#allocation2 + $0x88] sm:$0xff] %v212_v9  ;;  %245 = vst [vmem:[#allocation2 + $0xe8] sm:$0xff] %v213_v10  ;;  %v224_v21 = vld [vmem:[%s3156_s0 + $0xa8] sm:$0xff]  ;;  %v225_v22 = vld [vmem:[%s3156_s0 + $0xb0] sm:$0xff] }
  0x1c   : > { %246 = vst [vmem:[#allocation2 + $0xb8] sm:$0xff] %v214_v11  ;;  %308 = vst [vmem:[#allocation3 + $0xb0] sm:$0xff] %v212_v9  ;;  %v226_v23 = vld [vmem:[%s3156_s0 + $0xb8] sm:$0xff]  ;;  %v227_v24 = vld [vmem:[%s3156_s0 + $0xc0] sm:$0xff] }
  0x1d   : > { %309 = vst [vmem:[#allocation3 + $0x38] sm:$0xff] %v213_v10  ;;  %310 = vst [vmem:[#allocation3 + $0x40] sm:$0xff] %v214_v11  ;;  %v228_v25 = vld [vmem:[%s3156_s0 + $0xc8] sm:$0xff]  ;;  %v229_v26 = vld [vmem:[%s3156_s0 + $0xd0] sm:$0xff] }
  0x1e   : > { %247 = vst [vmem:[#allocation2 + $0x60] sm:$0xff] %v215_v12  ;;  %248 = vst [vmem:[#allocation2 + $0xf0] sm:$0xff] %v216_v13  ;;  %v230_v27 = vld [vmem:[%s3156_s0 + $0xd8] sm:$0xff]  ;;  %v231_v28 = vld [vmem:[%s3156_s0 + $0xe0] sm:$0xff] }
  0x1f   : > { %249 = vst [vmem:[#allocation2 + $0x8] sm:$0xff] %v217_v14  ;;  %311 = vst [vmem:[#allocation3 + $0xe0] sm:$0xff] %v215_v12  ;;  %v232_v29 = vld [vmem:[%s3156_s0 + $0xe8] sm:$0xff]  ;;  %v233_v30 = vld [vmem:[%s3156_s0 + $0xf0] sm:$0xff] }
  0x20   : > { %312 = vst [vmem:[#allocation3 + $0x60] sm:$0xff] %v216_v13  ;;  %313 = vst [vmem:[#allocation3 + $0x18] sm:$0xff] %v217_v14  ;;  %v234_v31 = vld [vmem:[%s3156_s0 + $0xf8] sm:$0xff] }
  0x21   : > { %250 = vst [vmem:[#allocation2 + $0x78] sm:$0xff] %v218_v15  ;;  %251 = vst [vmem:[#allocation2 + $0x38] sm:$0xff] %v219_v16 }
  0x22   : > { %252 = vst [vmem:[#allocation2 + $0x58] sm:$0xff] %v220_v17  ;;  %314 = vst [vmem:[#allocation3 + $0x68] sm:$0xff] %v218_v15 }
  0x23   : > { %315 = vst [vmem:[#allocation3 + $0x10] sm:$0xff] %v219_v16  ;;  %316 = vst [vmem:[#allocation3 + $0x70] sm:$0xff] %v220_v17 }
  0x24   : > { %253 = vst [vmem:[#allocation2 + $0x40] sm:$0xff] %v221_v18  ;;  %254 = vst [vmem:[#allocation2 + $0xc8] sm:$0xff] %v222_v19 }
  0x25   : > { %255 = vst [vmem:[#allocation2 + $0xe0] sm:$0xff] %v223_v20  ;;  %317 = vst [vmem:[#allocation3 + $0x50] sm:$0xff] %v221_v18 }
  0x26   : > { %318 = vst [vmem:[#allocation3 + $0xa0] sm:$0xff] %v222_v19  ;;  %319 = vst [vmem:[#allocation3 + $0xd8] sm:$0xff] %v223_v20 }
  0x27   : > { %256 = vst [vmem:[#allocation2 + $0x90] sm:$0xff] %v224_v21  ;;  %257 = vst [vmem:[#allocation2 + $0x70] sm:$0xff] %v225_v22 }
  0x28   : > { %258 = vst [vmem:[#allocation2 + $0xc0] sm:$0xff] %v226_v23  ;;  %320 = vst [vmem:[#allocation3 + $0x30] sm:$0xff] %v224_v21 }
  0x29   : > { %321 = vst [vmem:[#allocation3 + $0x20] sm:$0xff] %v225_v22  ;;  %322 = vst [vmem:[#allocation3 + $0xf0] sm:$0xff] %v226_v23 }
  0x2a   : > { %259 = vst [vmem:[#allocation2 + $0xa8] sm:$0xff] %v227_v24  ;;  %260 = vst [vmem:[#allocation2 + $0xd0] sm:$0xff] %v228_v25 }
  0x2b   : > { %261 = vst [vmem:[#allocation2 + $0x10] sm:$0xff] %v229_v26  ;;  %323 = vst [vmem:[#allocation3 + $0x88] sm:$0xff] %v227_v24 }
  0x2c   : > { %324 = vst [vmem:[#allocation3 + $0x48] sm:$0xff] %v228_v25  ;;  %325 = vst [vmem:[#allocation3 + $0xf8] sm:$0xff] %v229_v26 }
  0x2d   : > { %262 = vst [vmem:[#allocation2 + $0x28] sm:$0xff] %v230_v27  ;;  %263 = vst [vmem:[#allocation2 + $0xa0] sm:$0xff] %v231_v28 }
  0x2e   : > { %264 = vst [vmem:[#allocation2 + $0xf8] sm:$0xff] %v232_v29  ;;  %326 = vst [vmem:[#allocation3 + $0xc0] sm:$0xff] %v230_v27 }
  0x2f   : > { %327 = vst [vmem:[#allocation3 + $0xb8] sm:$0xff] %v231_v28  ;;  %328 = vst [vmem:[#allocation3] sm:$0xff] %v232_v29 }
  0x30   : > { %265 = vst [vmem:[#allocation2 + $0x20] sm:$0xff] %v233_v30  ;;  %266 = vst [vmem:[#allocation2 + $0x98] sm:$0xff] %v234_v31 }
  0x31   : > { %329 = vst [vmem:[#allocation3 + $0x28] sm:$0xff] %v233_v30  ;;  %330 = vst [vmem:[#allocation3 + $0x98] sm:$0xff] %v234_v31 }
  0x32 PF: > { %v2041_v32 = vld [vmem:[%s2311_s24 + $0x38] sm:$0xff]   ;;  %v2042_v33 = vld [vmem:[%s2311_s24 + $0x30] sm:$0xff]   ;;  %v2043_v34 = vld [vmem:[%s2311_s24 + $0x28] sm:$0xff]   ;;  %s981_s23 = ssub.s32 0, %s2295_s16  ;;  %p980_p5 = scmp.lt.s32.totalorder %s2295_s16, 0 }
  0x33   : > { %1960 = vmatprep.subr.bf16.mxu0 %v2041_v32  ;;  %v2044_v35 = vld [vmem:[%s2311_s24 + $0x20] sm:$0xff]   ;;  %v331_v36 = vld [vmem:[#allocation2 + $0xb0] sm:$0xff]  ;;  %v2045_v39 = vld [vmem:[%s2311_s24 + $0x18] sm:$0xff]   ;;  %s1813_s25 = smin.u32 %s2295_s16, %s981_s23 }
  0x34   : > { %1961 = vmatpush3.bf16.msra.mxu0 %v2041_v32  ;;  %v332_v37 = vld [vmem:[#allocation2] sm:$0xff]  ;;  %v2046_v40 = vld [vmem:[%s2311_s24 + $0x10] sm:$0xff]   ;;  %v2047_v41 = vld [vmem:[%s2311_s24 + $0x8] sm:$0xff]  }
  0x35   : > { %1962 = vmatprep.subr.bf16.mxu0 %v2042_v33  ;;  %v363_v38 = vpack.c.bf16 %v332_v37, %v331_v36  ;;  %v2048_v42 = vld [vmem:[%s2311_s24] sm:$0xff]   ;;  %v333_v43 = vld [vmem:[#allocation2 + $0xd8] sm:$0xff]  ;;  %v335_v45 = vld [vmem:[#allocation2 + $0x50] sm:$0xff]  ;;  %s983_s24 = sand.u32 1, %s1813_s25  }
  0x36   : > { %v334_v44 = vld [vmem:[#allocation2 + $0x18] sm:$0xff]  ;;  %v336_v46 = vld [vmem:[#allocation2 + $0x68] sm:$0xff]  ;;  %v337_v49 = vld [vmem:[#allocation2 + $0x30] sm:$0xff]  ;;  %s984_s26 = ssub.s32 0, %s983_s24 }
  0x37   : > { %1976 = vmatprep.mubr.bf16.mxu0 %v363_v38  ;;  %v364_v47 = vpack.c.bf16 %v334_v44, %v333_v43  ;;  %v365_v48 = vpack.c.bf16 %v336_v46, %v335_v45  ;;  %v338_v50 = vld [vmem:[#allocation2 + $0x48] sm:$0xff]  ;;  %v339_v51 = vld [vmem:[#allocation2 + $0x80] sm:$0xff]  ;;  %v342_v56 = vld [vmem:[#allocation2 + $0xb8] sm:$0xff]  ;;  %s3162_s26 = smov (!%p980_p5, %s984_s26), %s983_s24 }
  0x38   : > { %1963 = vmatpush3.bf16.msra.mxu0 %v2042_v33  ;;  %v340_v52 = vld [vmem:[#allocation2 + $0x88] sm:$0xff]  ;;  %v366_v53 = vpack.c.bf16 %v338_v50, %v337_v49  ;;  %v343_v57 = vld [vmem:[#allocation2 + $0x60] sm:$0xff]  ;;  %v344_v58 = vld [vmem:[#allocation2 + $0xf0] sm:$0xff]  ;;  %p1815_p6 = scmp.lt.s32.totalorder %s3162_s26, 0  ;;  %s990_s27 = sadd.s32 2, %s3162_s26 }
  0x39   : > { %1964 = vmatprep.subr.bf16.mxu0 %v2043_v34  ;;  %v367_v54 = vpack.c.bf16 %v340_v52, %v339_v51  ;;  %v341_v55 = vld [vmem:[#allocation2 + $0xe8] sm:$0xff]  ;;  %v369_v60 = vpack.c.bf16 %v344_v58, %v343_v57  ;;  %v346_v62 = vld [vmem:[#allocation2 + $0x78] sm:$0xff]  ;;  %v349_v3 = vld [vmem:[#allocation2 + $0x40] sm:$0xff] }
  0x3a   : > { %v368_v59 = vpack.c.bf16 %v342_v56, %v341_v55  ;;  %v345_v61 = vld [vmem:[#allocation2 + $0x8] sm:$0xff]  ;;  %v347_v63 = vld [vmem:[#allocation2 + $0x38] sm:$0xff]  ;;  %v351_v5 = vld [vmem:[#allocation2 + $0xe0] sm:$0xff]  ;;  %s3164_s27 = smov (!%p1815_p6, %s990_s27), %s3162_s26 }
  0x3b   : > { %v348_v0 = vld [vmem:[#allocation2 + $0x58] sm:$0xff]  ;;  %v370_v1 = vpack.c.bf16 %v346_v62, %v345_v61  ;;  %v350_v4 = vld [vmem:[#allocation2 + $0xc8] sm:$0xff]  ;;  %v352_v6 = vld [vmem:[#allocation2 + $0x90] sm:$0xff]  ;;  %p1816_p7 = scmp.eq.s32.totalorder %s3164_s27, 1 }
  0x3c   : > { %1965 = vmatpush3.bf16.msra.mxu0 %v2043_v34  ;;  %v371_v2 = vpack.c.bf16 %v348_v0, %v347_v63  ;;  %v372_v7 = vpack.c.bf16 %v350_v4, %v349_v3  ;;  %v373_v8 = vpack.c.bf16 %v352_v6, %v351_v5  ;;  %v353_v9 = vld [vmem:[#allocation2 + $0x70] sm:$0xff]  ;;  %v354_v10 = vld [vmem:[#allocation2 + $0xc0] sm:$0xff]  ;;  %v355_v11 = vld [vmem:[#allocation2 + $0xa8] sm:$0xff] }
  0x3d   : > { %1966 = vmatprep.subr.bf16.mxu0 %v2044_v35  ;;  %v356_v12 = vld [vmem:[#allocation2 + $0xd0] sm:$0xff]  ;;  %v374_v13 = vpack.c.bf16 %v354_v10, %v353_v9  ;;  %v358_v16 = vld [vmem:[#allocation2 + $0x28] sm:$0xff]  ;;  %v359_v17 = vld [vmem:[#allocation2 + $0xa0] sm:$0xff] }
  0x3e   : > { %v375_v14 = vpack.c.bf16 %v356_v12, %v355_v11  ;;  %v357_v15 = vld [vmem:[#allocation2 + $0x10] sm:$0xff]  ;;  %v360_v18 = vld [vmem:[#allocation2 + $0xf8] sm:$0xff]  ;;  %v361_v21 = vld [vmem:[#allocation2 + $0x20] sm:$0xff] }
  0x3f   : > { %v376_v19 = vpack.c.bf16 %v358_v16, %v357_v15  ;;  %v377_v20 = vpack.c.bf16 %v360_v18, %v359_v17  ;;  %v362_v22 = vld [vmem:[#allocation2 + $0x98] sm:$0xff]  ;;  %v2051_v24 = vld [vmem:[%s3157_s1 + $0x44] ss:$8 sps:$4 sm:$0xff]   ;;  %v2049_v10 = vld [vmem:[%s3157_s1 + $0x40] ss:$8 sps:$4 sm:$0xff]  }
  0x40   : > { %1967 = vmatpush3.bf16.msra.mxu0 %v2044_v35  ;;  %v378_v23 = vpack.c.bf16 %v362_v22, %v361_v21  ;;  %883 = vmatprep.mubr.bf16.mxu1 %v2051_v24  ;;  %v2073_v11 = vld [vmem:[%s3157_s1] ss:$8 sps:$4 sm:$0xff]   ;;  %v2052_v12 = vld [vmem:[%s3157_s1 + $0x54] ss:$8 sps:$4 sm:$0xff]   ;;  %v2081_v15 = vld [vmem:[%s3157_s1 + $0x10] ss:$8 sps:$4 sm:$0xff]  }
  0x41   : > { %1968 = vmatprep.subr.bf16.mxu0 %v2045_v39  ;;  %v2055_v16 = vld [vmem:[%s3157_s1 + $0x64] ss:$8 sps:$4 sm:$0xff]   ;;  %v2057_v18 = vld [vmem:[%s3157_s1 + $0x60] ss:$8 sps:$4 sm:$0xff]   ;;  %v2091_v21 = vld [vmem:[%s3157_s1 + $0x34] ss:$8 sps:$4 sm:$0xff]  }
  0x42   : > { %v2085_v17 = vld [vmem:[%s3157_s1 + $0x24] ss:$8 sps:$4 sm:$0xff]   ;;  %v2060_v22 = vld [vmem:[%s3157_s1 + $0x70] ss:$8 sps:$4 sm:$0xff]  }
  0x43   : > { %v2061_v24 = vld [vmem:[%s3157_s1 + $0x84] ss:$8 sps:$4 sm:$0xff]  }
  0x44   : > { %1969 = vmatpush3.bf16.msra.mxu0 %v2045_v39 }
  0x45   : > { %1970 = vmatprep.subr.bf16.mxu0 %v2046_v40 }
  0x48   : > { %1971 = vmatpush3.bf16.msra.mxu0 %v2046_v40 }
  0x49   : > { %1972 = vmatprep.subr.bf16.mxu0 %v2047_v41 }
  0x4c   : > { %1973 = vmatpush3.bf16.msra.mxu0 %v2047_v41  ;;  %v2075_v41 = vld [vmem:[%s3157_s1 + $0x4] ss:$8 sps:$4 sm:$0xff]  }
  0x4d   : > { %1974 = vmatprep.subr.bf16.mxu0 %v2048_v42 }
  0x50   : > { %1975 = vmatpush3.bf16.msra.mxu0 %v2048_v42 }
  0x53   : > { %1977 = vmatmul.mubr.bf16.vlgmr.msra.gmra.mxu0 %v364_v47 }
  0x54   : > { %1980 = vmatprep.mubr.bf16.mxu0 %v365_v48 }
  0x5b   : > { %1981 = vmatmul.mubr.bf16.gmra.mxu0 %v366_v53 }
  0x5c   : > { %1984 = vmatprep.mubr.bf16.mxu0 %v367_v54 }
  0x63   : > { %1985 = vmatmul.mubr.bf16.gmra.mxu0 %v368_v59 }
  0x64   : > { %1988 = vmatprep.mubr.bf16.mxu0 %v369_v60 }
  0x6b   : > { %1989 = vmatmul.mubr.bf16.gmra.mxu0 %v370_v1 }
  0x6c   : > { %1992 = vmatprep.mubr.bf16.mxu0 %v371_v2 }
  0x73   : > { %1993 = vmatmul.mubr.bf16.gmra.mxu0 %v372_v7 }
  0x74   : > { %1996 = vmatprep.mubr.bf16.mxu0 %v373_v8 }
  0x7b   : > { %1997 = vmatmul.mubr.bf16.gmra.mxu0 %v374_v13  ;;  %v2079_v13 = vld [vmem:[%s3157_s1 + $0x14] ss:$8 sps:$4 sm:$0xff]  }
  0x7c   : > { %2000 = vmatprep.mubr.bf16.mxu0 %v375_v14  ;;  %v2054_v14 = vld [vmem:[%s3157_s1 + $0x50] ss:$8 sps:$4 sm:$0xff]  }
  0x83   : > { %2001 = vmatmul.mubr.bf16.gmra.mxu0 %v376_v19  ;;  %v2087_v19 = vld [vmem:[%s3157_s1 + $0x20] ss:$8 sps:$4 sm:$0xff]  }
  0x84   : > { %2004 = vmatprep.mubr.bf16.mxu0 %v377_v20  ;;  %v2058_v20 = vld [vmem:[%s3157_s1 + $0x74] ss:$8 sps:$4 sm:$0xff]  }
  0x8b   : > { %2005 = vmatmul.mubr.bf16.gmra.mxu0 %v378_v23  ;;  %v2093_v23 = vld [vmem:[%s3157_s1 + $0x30] ss:$8 sps:$4 sm:$0xff]  }
  0x8c   : > { %851 = vmatprep.mubr.bf16.mxu0 %v2075_v41 }
 0x113   : > { %v1978_v25 = vpop.f32.mrf.mxu0 }
 0x115   : > { %v477_v26 = vpop.f32.mrf.mxu0 }
 0x117   : > { %v1979_v27 = vpop.f32.mrf.mxu0 }
 0x118   : > { %v2421_v28 = vpack.c.bf16 %v1979_v27, %v1978_v25  ;;  %v2063_v25 = vld [vmem:[%s3157_s1 + $0x80] ss:$8 sps:$4 sm:$0xff]   ;;  %v2066_v27 = vld [vmem:[%s3157_s1 + $0x90] ss:$8 sps:$4 sm:$0xff]  }
 0x119   : > { %v480_v29 = vpop.f32.mrf.mxu0 }
 0x11a   : > { %v2423_v30 = vpack.c.bf16 %v480_v29, %v477_v26  ;;  %v2064_v26 = vld [vmem:[%s3157_s1 + $0x94] ss:$8 sps:$4 sm:$0xff]   ;;  %v2069_v29 = vld [vmem:[%s3157_s1 + $0xa0] ss:$8 sps:$4 sm:$0xff]  }
 0x11b   : > { %v1982_v31 = vpop.f32.mrf.mxu0 }
 0x11d   : > { %v493_v32 = vpop.f32.mrf.mxu0 }
 0x11f   : > { %v1983_v33 = vpop.f32.mrf.mxu0 }
 0x120   : > { %v639_v34 = vpack.c.bf16 %v1983_v33, %v1982_v31  ;;  %v2072_v31 = vld [vmem:[%s3157_s1 + $0xb0] ss:$8 sps:$4 sm:$0xff]   ;;  %v2078_v33 = vld [vmem:[%s3157_s1 + $0xc0] ss:$8 sps:$4 sm:$0xff]  }
 0x121   : > { %v496_v35 = vpop.f32.mrf.mxu0 }
 0x122   : > { %v638_v36 = vpack.c.bf16 %v496_v35, %v493_v32  ;;  %v2076_v32 = vld [vmem:[%s3157_s1 + $0xc4] ss:$8 sps:$4 sm:$0xff]   ;;  %v2084_v35 = vld [vmem:[%s3157_s1 + $0xd0] ss:$8 sps:$4 sm:$0xff]  }
 0x123   : > { %v1986_v37 = vpop.f32.mrf.mxu0 }
 0x125   : > { %v509_v38 = vpop.f32.mrf.mxu0 }
 0x127   : > { %v1987_v39 = vpop.f32.mrf.mxu0 }
 0x128   : > { %v641_v3 = vpack.c.bf16 %v1987_v39, %v1986_v37  ;;  %v2090_v37 = vld [vmem:[%s3157_s1 + $0xe0] ss:$8 sps:$4 sm:$0xff]   ;;  %v2096_v39 = vld [vmem:[%s3157_s1 + $0xf0] ss:$8 sps:$4 sm:$0xff]  }
 0x129   : > { %v512_v40 = vpop.f32.mrf.mxu0 }
 0x12a   : > { %v640_v5 = vpack.c.bf16 %v512_v40, %v509_v38  ;;  %v2094_v38 = vld [vmem:[%s3157_s1 + $0xf4] ss:$8 sps:$4 sm:$0xff]  }
 0x12b   : > { %v1990_v42 = vpop.f32.mrf.mxu0 }
 0x12d   : > { %v525_v43 = vpop.f32.mrf.mxu0 }
 0x12f   : > { %v1991_v44 = vpop.f32.mrf.mxu0 }
 0x130   : > { %v643_v62 = vpack.c.bf16 %v1991_v44, %v1990_v42  ;;  %v2532_v42 = vld [vmem:[%s197_s21] ss:$0 sm:$0xff] }
 0x131   : > { %v528_v45 = vpop.f32.mrf.mxu0 }
 0x132   : > { %v642_v1 = vpack.c.bf16 %v528_v45, %v525_v43 }
 0x133   : > { %v1994_v46 = vpop.f32.mrf.mxu0 }
 0x135   : > { %v541_v47 = vpop.f32.mrf.mxu0 }
 0x137   : > { %v1995_v48 = vpop.f32.mrf.mxu0 }
 0x138   : > { %v645_v8 = vpack.c.bf16 %v1995_v48, %v1994_v46 }
 0x139   : > { %v544_v49 = vpop.f32.mrf.mxu0 }
 0x13a   : > { %v644_v9 = vpack.c.bf16 %v544_v49, %v541_v47 }
 0x13b   : > { %v1998_v50 = vpop.f32.mrf.mxu0 }
 0x13d   : > { %v557_v51 = vpop.f32.mrf.mxu0 }
 0x13f   : > { %v1999_v52 = vpop.f32.mrf.mxu0 }
 0x140   : > { %v647_v6 = vpack.c.bf16 %v1999_v52, %v1998_v50 }
 0x141   : > { %v560_v53 = vpop.f32.mrf.mxu0 }
 0x142   : > { %v646_v7 = vpack.c.bf16 %v560_v53, %v557_v51 }
 0x143   : > { %v2002_v54 = vpop.f32.mrf.mxu0 }
 0x145   : > { %v573_v55 = vpop.f32.mrf.mxu0 }
 0x147   : > { %v2003_v56 = vpop.f32.mrf.mxu0 }
 0x148   : > { %v649_v2 = vpack.c.bf16 %v2003_v56, %v2002_v54 }
 0x149   : > { %v576_v57 = vpop.f32.mrf.mxu0 }
 0x14a   : > { %v648_v4 = vpack.c.bf16 %v576_v57, %v573_v55 }
 0x14b   : > { %v2006_v58 = vpop.f32.mrf.mxu0 }
 0x14d   : > { %v589_v59 = vpop.f32.mrf.mxu0 }
 0x14f   : > { %v2007_v60 = vpop.f32.mrf.mxu0 }
 0x150   : > { %v651_v61 = vpack.c.bf16 %v2007_v60, %v2006_v58 }
 0x151   : > { %v592_v63 = vpop.f32.mrf.mxu0 }
 0x152   : > { %v650_v0 = vpack.c.bf16 %v592_v63, %v589_v59  ;;  %1848 = vmatprep.subr.bf16.mxu0 %v651_v61  ;;  %2008 = vmatprep.subr.bf16.mxu1 %v651_v61 }
 0x153   : > { %1849 = vmatpush3.bf16.msra.mxu0 %v643_v62  ;;  %2016 = vmatpush3.bf16.msra.mxu1 %v643_v62 }
 0x154   : > { %1850 = vmatprep.subr.bf16.mxu0 %v650_v0  ;;  %2009 = vmatprep.subr.bf16.mxu1 %v650_v0 }
 0x157   : > { %1851 = vmatpush3.bf16.msra.mxu0 %v642_v1  ;;  %2017 = vmatpush3.bf16.msra.mxu1 %v642_v1 }
 0x158   : > { %1852 = vmatprep.subr.bf16.mxu0 %v649_v2  ;;  %2010 = vmatprep.subr.bf16.mxu1 %v649_v2 }
 0x15b   : > { %1853 = vmatpush3.bf16.msra.mxu0 %v641_v3  ;;  %2018 = vmatpush3.bf16.msra.mxu1 %v641_v3 }
 0x15c   : > { %1854 = vmatprep.subr.bf16.mxu0 %v648_v4  ;;  %2011 = vmatprep.subr.bf16.mxu1 %v648_v4 }
 0x15f   : > { %1855 = vmatpush3.bf16.msra.mxu0 %v640_v5  ;;  %2019 = vmatpush3.bf16.msra.mxu1 %v640_v5 }
 0x160   : > { %1856 = vmatprep.subr.bf16.mxu0 %v647_v6  ;;  %2012 = vmatprep.subr.bf16.mxu1 %v647_v6 }
 0x163   : > { %1857 = vmatpush3.bf16.msra.mxu0 %v639_v34  ;;  %2020 = vmatpush3.bf16.msra.mxu1 %v639_v34  ;;  %v2082_v34 = vld [vmem:[%s3157_s1 + $0xd4] ss:$8 sps:$4 sm:$0xff]  }
 0x164   : > { %1858 = vmatprep.subr.bf16.mxu0 %v646_v7  ;;  %2013 = vmatprep.subr.bf16.mxu1 %v646_v7 }
 0x167   : > { %1859 = vmatpush3.bf16.msra.mxu0 %v638_v36  ;;  %2021 = vmatpush3.bf16.msra.mxu1 %v638_v36  ;;  %v2088_v36 = vld [vmem:[%s3157_s1 + $0xe4] ss:$8 sps:$4 sm:$0xff]  }
 0x168   : > { %1860 = vmatprep.subr.bf16.mxu0 %v645_v8  ;;  %2014 = vmatprep.subr.bf16.mxu1 %v645_v8 }
 0x16b   : > { %1861 = vmatpush3.bf16.msra.mxu0 %v2421_v28  ;;  %2022 = vmatpush3.bf16.msra.mxu1 %v2421_v28  ;;  %v2067_v28 = vld [vmem:[%s3157_s1 + $0xa4] ss:$8 sps:$4 sm:$0xff]  }
 0x16c   : > { %1862 = vmatprep.subr.bf16.mxu0 %v644_v9  ;;  %2015 = vmatprep.subr.bf16.mxu1 %v644_v9 }
 0x16f   : > { %1863 = vmatpush3.bf16.msra.mxu0 %v2423_v30  ;;  %2023 = vmatpush3.bf16.msra.mxu1 %v2423_v30  ;;  %v2070_v30 = vld [vmem:[%s3157_s1 + $0xb4] ss:$8 sps:$4 sm:$0xff]  }
 0x172   : > { %884 = vmatmul.mubr.bf16.vlgmr.msra.gmra.mxu1 %v2049_v10  ;;  %852 = vmatmul.mubr.bf16.vlgmr.msra.gmra.mxu0 %v2073_v11 }
 0x173   : > { %891 = vmatprep.mubr.bf16.mxu1 %v2052_v12  ;;  %859 = vmatprep.mubr.bf16.mxu0 %v2079_v13 }
 0x17a   : > { %892 = vmatmul.mubr.bf16.gmra.mxu1 %v2054_v14  ;;  %860 = vmatmul.mubr.bf16.gmra.mxu0 %v2081_v15 }
 0x17b   : > { %899 = vmatprep.mubr.bf16.mxu1 %v2055_v16  ;;  %867 = vmatprep.mubr.bf16.mxu0 %v2085_v17 }
 0x182   : > { %900 = vmatmul.mubr.bf16.gmra.mxu1 %v2057_v18  ;;  %868 = vmatmul.mubr.bf16.gmra.mxu0 %v2087_v19 }
 0x183   : > { %907 = vmatprep.mubr.bf16.mxu1 %v2058_v20  ;;  %875 = vmatprep.mubr.bf16.mxu0 %v2091_v21 }
 0x18a   : > { %908 = vmatmul.mubr.bf16.gmra.mxu1 %v2060_v22  ;;  %876 = vmatmul.mubr.bf16.gmra.mxu0 %v2093_v23 }
 0x18b   : > { %915 = vmatprep.mubr.bf16.mxu1 %v2061_v24 }
 0x192   : > { %916 = vmatmul.mubr.bf16.gmra.mxu1 %v2063_v25 }
 0x193   : > { %923 = vmatprep.mubr.bf16.mxu1 %v2064_v26 }
 0x19a   : > { %924 = vmatmul.mubr.bf16.gmra.mxu1 %v2066_v27 }
 0x19b   : > { %931 = vmatprep.mubr.bf16.mxu1 %v2067_v28 }
 0x1a2   : > { %932 = vmatmul.mubr.bf16.gmra.mxu1 %v2069_v29 }
 0x1a3   : > { %939 = vmatprep.mubr.bf16.mxu1 %v2070_v30 }
 0x1aa   : > { %940 = vmatmul.mubr.bf16.gmra.mxu1 %v2072_v31 }
 0x1ab   : > { %947 = vmatprep.mubr.bf16.mxu1 %v2076_v32 }
 0x1b2   : > { %948 = vmatmul.mubr.bf16.gmra.mxu1 %v2078_v33 }
 0x1b3   : > { %955 = vmatprep.mubr.bf16.mxu1 %v2082_v34 }
 0x1ba   : > { %956 = vmatmul.mubr.bf16.gmra.mxu1 %v2084_v35 }
 0x1bb   : > { %963 = vmatprep.mubr.bf16.mxu1 %v2088_v36 }
 0x1c2   : > { %964 = vmatmul.mubr.bf16.gmra.mxu1 %v2090_v37 }
 0x1c3   : > { %971 = vmatprep.mubr.bf16.mxu1 %v2094_v38 }
 0x1ca   : > { %972 = vmatmul.mubr.bf16.gmra.mxu1 %v2096_v39 }
 0x232   : > { %v1888_v40 = vpop.f32.mrf.mxu1  ;;  %v1864_v41 = vpop.f32.mrf.mxu0 }
 0x234   : > { %v1889_v43 = vpop.f32.mrf.mxu1  ;;  %v1865_v44 = vpop.f32.mrf.mxu0 }
 0x235   : > { %v1890_v45 = vadd.f32 %v1889_v43, %v1888_v40  ;;  %v1866_v46 = vadd.f32 %v1865_v44, %v1864_v41 }
 0x236   : > { %v1891_v47 = vpop.f32.mrf.mxu1  ;;  %v1867_v48 = vpop.f32.mrf.mxu0 }
 0x237   : > { %v2535_v49 = vadd.f32 %v1890_v45, %v2532_v42  ;;  %v2538_v50 = vadd.f32 %v1866_v46, %v2532_v42 }
 0x238   : > { %v1892_v51 = vpop.f32.mrf.mxu1  ;;  %v1868_v52 = vpop.f32.mrf.mxu0 }
 0x239   : > { %v1893_v53 = vadd.f32 %v1892_v51, %v1891_v47  ;;  %v1869_v54 = vadd.f32 %v1868_v52, %v1867_v48 }
 0x23a   : > { %v1894_v55 = vpop.f32.mrf.mxu1  ;;  %v1870_v56 = vpop.f32.mrf.mxu0 }
 0x23b   : > { %v2541_v57 = vadd.f32 %v1893_v53, %v2532_v42  ;;  %v2544_v58 = vadd.f32 %v1869_v54, %v2532_v42 }
 0x23c   : > { %v1895_v59 = vpop.f32.mrf.mxu1  ;;  %v1871_v60 = vpop.f32.mrf.mxu0 }
 0x23d   : > { %v1896_v61 = vadd.f32 %v1895_v59, %v1894_v55  ;;  %v1872_v62 = vadd.f32 %v1871_v60, %v1870_v56 }
 0x23e   : > { %v1897_v63 = vpop.f32.mrf.mxu1  ;;  %v1873_v0 = vpop.f32.mrf.mxu0 }
 0x23f   : > { %v2547_v1 = vadd.f32 %v1896_v61, %v2532_v42  ;;  %v2550_v2 = vadd.f32 %v1872_v62, %v2532_v42 }
 0x240   : > { %v1898_v3 = vpop.f32.mrf.mxu1  ;;  %v1874_v4 = vpop.f32.mrf.mxu0 }
 0x241   : > { %v1899_v5 = vadd.f32 %v1898_v3, %v1897_v63  ;;  %v1875_v6 = vadd.f32 %v1874_v4, %v1873_v0 }
 0x242   : > { %v1900_v7 = vpop.f32.mrf.mxu1  ;;  %v1876_v8 = vpop.f32.mrf.mxu0 }
 0x243   : > { %v2553_v9 = vadd.f32 %v1899_v5, %v2532_v42  ;;  %v2556_v10 = vadd.f32 %v1875_v6, %v2532_v42 }
 0x244   : > { %v1901_v11 = vpop.f32.mrf.mxu1  ;;  %v1877_v12 = vpop.f32.mrf.mxu0 }
 0x245   : > { %v1902_v13 = vadd.f32 %v1901_v11, %v1900_v7  ;;  %v1878_v14 = vadd.f32 %v1877_v12, %v1876_v8 }
 0x246   : > { %v1903_v15 = vpop.f32.mrf.mxu1  ;;  %v1879_v16 = vpop.f32.mrf.mxu0 }
 0x247   : > { %v2559_v17 = vadd.f32 %v1902_v13, %v2532_v42  ;;  %v2562_v18 = vadd.f32 %v1878_v14, %v2532_v42 }
 0x248   : > { %v1904_v19 = vpop.f32.mrf.mxu1  ;;  %v1880_v20 = vpop.f32.mrf.mxu0 }
 0x249   : > { %v1905_v21 = vadd.f32 %v1904_v19, %v1903_v15  ;;  %v1881_v22 = vadd.f32 %v1880_v20, %v1879_v16 }
 0x24a   : > { %v1906_v23 = vpop.f32.mrf.mxu1  ;;  %v1882_v24 = vpop.f32.mrf.mxu0 }
 0x24b   : > { %v2565_v25 = vadd.f32 %v1905_v21, %v2532_v42  ;;  %v2568_v26 = vadd.f32 %v1881_v22, %v2532_v42 }
 0x24c   : > { %v1907_v27 = vpop.f32.mrf.mxu1  ;;  %v1883_v28 = vpop.f32.mrf.mxu0 }
 0x24d   : > { %v1908_v29 = vadd.f32 %v1907_v27, %v1906_v23  ;;  %v1884_v30 = vadd.f32 %v1883_v28, %v1882_v24 }
 0x24e   : > { %v1909_v31 = vpop.f32.mrf.mxu1  ;;  %v1885_v32 = vpop.f32.mrf.mxu0 }
 0x24f   : > { %v2571_v33 = vadd.f32 %v1908_v29, %v2532_v42  ;;  %v2574_v34 = vadd.f32 %v1884_v30, %v2532_v42 }
 0x250   : > { %v1910_v35 = vpop.f32.mrf.mxu1  ;;  %v1886_v36 = vpop.f32.mrf.mxu0 }
 0x251   : > { %v1911_v37 = vadd.f32 %v1910_v35, %v1909_v31  ;;  %v1887_v38 = vadd.f32 %v1886_v36, %v1885_v32 }
 0x252   : > { %v1912_v39 = vpop.f32.mrf.mxu1 }
 0x253   : > { %v2577_v40 = vadd.f32 %v1911_v37, %v2532_v42  ;;  %v2580_v41 = vadd.f32 %v1887_v38, %v2532_v42 }
 0x254   : > { %v1913_v43 = vpop.f32.mrf.mxu1 }
 0x255   : > { %v1914_v44 = vadd.f32 %v1913_v43, %v1912_v39 }
 0x256   : > { %v1915_v45 = vpop.f32.mrf.mxu1 }
 0x257   : > { %v2583_v46 = vadd.f32 %v1914_v44, %v2532_v42 }
 0x258   : > { %v1916_v47 = vpop.f32.mrf.mxu1 }
 0x259   : > { %v1917_v48 = vadd.f32 %v1916_v47, %v1915_v45 }
 0x25a   : > { %v1918_v51 = vpop.f32.mrf.mxu1 }
 0x25b   : > { %v2586_v52 = vadd.f32 %v1917_v48, %v2532_v42 }
 0x25c   : > { %v1919_v53 = vpop.f32.mrf.mxu1 }
 0x25d   : > { %v1920_v54 = vadd.f32 %v1919_v53, %v1918_v51 }
 0x25e   : > { %v1921_v55 = vpop.f32.mrf.mxu1 }
 0x25f   : > { %v2589_v56 = vadd.f32 %v1920_v54, %v2532_v42 }
 0x260   : > { %v1922_v59 = vpop.f32.mrf.mxu1 }
 0x261   : > { %v1923_v60 = vadd.f32 %v1922_v59, %v1921_v55 }
 0x262   : > { %v1924_v61 = vpop.f32.mrf.mxu1 }
 0x263   : > { %v2592_v62 = vadd.f32 %v1923_v60, %v2532_v42 }
 0x264   : > { %v1925_v63 = vpop.f32.mrf.mxu1 }
 0x265   : > { %v1926_v0 = vadd.f32 %v1925_v63, %v1924_v61 }
 0x266   : > { %v1927_v3 = vpop.f32.mrf.mxu1 }
 0x267   : > { %v2595_v4 = vadd.f32 %v1926_v0, %v2532_v42 }
 0x268   : > { %v1928_v5 = vpop.f32.mrf.mxu1 }
 0x269   : > { %v1929_v6 = vadd.f32 %v1928_v5, %v1927_v3 }
 0x26a   : > { %v1930_v7 = vpop.f32.mrf.mxu1 }
 0x26b   : > { %v2598_v8 = vadd.f32 %v1929_v6, %v2532_v42 }
 0x26c   : > { %v1931_v11 = vpop.f32.mrf.mxu1 }
 0x26d   : > { %v1932_v12 = vadd.f32 %v1931_v11, %v1930_v7 }
 0x26e   : > { %v1933_v13 = vpop.f32.mrf.mxu1 }
 0x26f   : > { %v2601_v14 = vadd.f32 %v1932_v12, %v2532_v42 }
 0x270   : > { %v1934_v15 = vpop.f32.mrf.mxu1 }
 0x271   : > { %v1935_v16 = vadd.f32 %v1934_v15, %v1933_v13 }
 0x272   : > { %v1936_v19 = vpop.f32.mrf.mxu1 }
 0x273   : > { %v2604_v20 = vadd.f32 %v1935_v16, %v2532_v42 }
 0x274   : > { %v1937_v21 = vpop.f32.mrf.mxu1 }
 0x275   : > { %v1938_v22 = vadd.f32 %v1937_v21, %v1936_v19 }
 0x276   : > { %v1939_v23 = vpop.f32.mrf.mxu1 }
 0x277   : > { %v2607_v24 = vadd.f32 %v1938_v22, %v2532_v42 }
 0x278   : > { %v1940_v27 = vpop.f32.mrf.mxu1 }
 0x279   : > { %v1941_v28 = vadd.f32 %v1940_v27, %v1939_v23 }
 0x27a   : > { %v1942_v29 = vpop.f32.mrf.mxu1 }
 0x27b   : > { %v2610_v30 = vadd.f32 %v1941_v28, %v2532_v42 }
 0x27c   : > { %v1943_v31 = vpop.f32.mrf.mxu1 }
 0x27d   : > { %v1944_v32 = vadd.f32 %v1943_v31, %v1942_v29 }
 0x27e   : > { %v1945_v35 = vpop.f32.mrf.mxu1 }
 0x27f   : > { %v2613_v36 = vadd.f32 %v1944_v32, %v2532_v42 }
 0x280   : > { %v1946_v37 = vpop.f32.mrf.mxu1 }
 0x281   : > { %v1947_v38 = vadd.f32 %v1946_v37, %v1945_v35 }
 0x282   : > { %v1948_v39 = vpop.f32.mrf.mxu1 }
 0x283   : > { %v2616_v43 = vadd.f32 %v1947_v38, %v2532_v42 }
 0x284   : > { %v1949_v44 = vpop.f32.mrf.mxu1 }
 0x285   : > { %v1950_v45 = vadd.f32 %v1949_v44, %v1948_v39 }
 0x286   : > { %v1951_v47 = vpop.f32.mrf.mxu1 }
 0x287   : > { %v2619_v48 = vadd.f32 %v1950_v45, %v2532_v42 }
 0x288   : > { %v1952_v51 = vpop.f32.mrf.mxu1 }
 0x289   : > { %v1953_v53 = vadd.f32 %v1952_v51, %v1951_v47 }
 0x28a   : > { %v1954_v54 = vpop.f32.mrf.mxu1 }
 0x28b   : > { %v2622_v55 = vadd.f32 %v1953_v53, %v2532_v42 }
 0x28c   : > { %v1955_v59 = vpop.f32.mrf.mxu1 }
 0x28d   : > { %v1956_v60 = vadd.f32 %v1955_v59, %v1954_v54 }
 0x28e   : > { %v1957_v61 = vpop.f32.mrf.mxu1 }
 0x28f   : > { %v2625_v63 = vadd.f32 %v1956_v60, %v2532_v42  ;;  %996 = sbr.rel (%p1816_p7) target bundleno = 678 (0x2a6), region = 44 }
 0x290   : > { %v1958_v0 = vpop.f32.mrf.mxu1 }
 0x291   : > { %v1959_v3 = vadd.f32 %v1958_v0, %v1957_v61 }
 0x293   : > { %v2628_v5 = vadd.f32 %v1959_v3, %v2532_v42 }
 0x294   : > { %v997_v6 = vmax.f32 %v2538_v50, 0.0  ;;  %v998_v7 = vmax.f32 %v2544_v58, 0.0  ;;  %v999_v11 = vmax.f32 %v2550_v2, 0.0  ;;  %v1000_v12 = vmax.f32 %v2556_v10, 0.0 }
 0x295   : > { %v1001_v13 = vmax.f32 %v2562_v18, 0.0  ;;  %v1002_v15 = vmax.f32 %v2568_v26, 0.0  ;;  %v1003_v16 = vmax.f32 %v2574_v34, 0.0  ;;  %v1004_v42 = vmax.f32 %v2580_v41, 0.0 }
 0x296   : > { %1029 = vst [vmem:[#allocation2 + $0xb0] sm:$0xff] %v997_v6  ;;  %1030 = vst [vmem:[#allocation2] sm:$0xff] %v998_v7  ;;  %v1005_v19 = vmax.f32 %v2535_v49, 0.0  ;;  %v1006_v21 = vmax.f32 %v2541_v57, 0.0  ;;  %v1007_v22 = vmax.f32 %v2547_v1, 0.0  ;;  %v1008_v23 = vmax.f32 %v2553_v9, 0.0 }
 0x297   : > { %1031 = vst [vmem:[#allocation2 + $0xd8] sm:$0xff] %v999_v11  ;;  %1032 = vst [vmem:[#allocation2 + $0x18] sm:$0xff] %v1000_v12  ;;  %v1009_v27 = vmax.f32 %v2559_v17, 0.0  ;;  %v1010_v28 = vmax.f32 %v2565_v25, 0.0  ;;  %v1011_v29 = vmax.f32 %v2571_v33, 0.0  ;;  %v1012_v31 = vmax.f32 %v2577_v40, 0.0 }
 0x298   : > { %1033 = vst [vmem:[#allocation2 + $0x50] sm:$0xff] %v1001_v13  ;;  %1034 = vst [vmem:[#allocation2 + $0x68] sm:$0xff] %v1002_v15  ;;  %v1013_v32 = vmax.f32 %v2583_v46, 0.0  ;;  %v1014_v35 = vmax.f32 %v2586_v52, 0.0  ;;  %v1015_v37 = vmax.f32 %v2589_v56, 0.0  ;;  %v1016_v38 = vmax.f32 %v2592_v62, 0.0 }
 0x299   : > { %1035 = vst [vmem:[#allocation2 + $0x30] sm:$0xff] %v1003_v16  ;;  %1036 = vst [vmem:[#allocation2 + $0x48] sm:$0xff] %v1004_v42  ;;  %v1017_v39 = vmax.f32 %v2595_v4, 0.0  ;;  %v1018_v44 = vmax.f32 %v2598_v8, 0.0  ;;  %v1019_v45 = vmax.f32 %v2601_v14, 0.0  ;;  %v1020_v47 = vmax.f32 %v2604_v20, 0.0 }
 0x29a   : > { %1037 = vst [vmem:[#allocation2 + $0x80] sm:$0xff] %v1005_v19  ;;  %1038 = vst [vmem:[#allocation2 + $0x88] sm:$0xff] %v1006_v21  ;;  %v1021_v51 = vmax.f32 %v2607_v24, 0.0  ;;  %v1022_v53 = vmax.f32 %v2610_v30, 0.0  ;;  %v1023_v54 = vmax.f32 %v2613_v36, 0.0  ;;  %v1024_v59 = vmax.f32 %v2616_v43, 0.0 }
 0x29b   : > { %1039 = vst [vmem:[#allocation2 + $0xe8] sm:$0xff] %v1007_v22  ;;  %1040 = vst [vmem:[#allocation2 + $0xb8] sm:$0xff] %v1008_v23  ;;  %v1025_v60 = vmax.f32 %v2619_v48, 0.0  ;;  %v1026_v61 = vmax.f32 %v2622_v55, 0.0  ;;  %v1027_v0 = vmax.f32 %v2625_v63, 0.0  ;;  %v1028_v3 = vmax.f32 %v2628_v5, 0.0 }
 0x29c   : > { %1041 = vst [vmem:[#allocation2 + $0x60] sm:$0xff] %v1009_v27  ;;  %1042 = vst [vmem:[#allocation2 + $0xf0] sm:$0xff] %v1010_v28 }
 0x29d   : > { %1043 = vst [vmem:[#allocation2 + $0x8] sm:$0xff] %v1011_v29  ;;  %1044 = vst [vmem:[#allocation2 + $0x78] sm:$0xff] %v1012_v31 }
 0x29e   : > { %1045 = vst [vmem:[#allocation2 + $0x38] sm:$0xff] %v1013_v32  ;;  %1046 = vst [vmem:[#allocation2 + $0x58] sm:$0xff] %v1014_v35 }
 0x29f   : > { %1047 = vst [vmem:[#allocation2 + $0x40] sm:$0xff] %v1015_v37  ;;  %1048 = vst [vmem:[#allocation2 + $0xc8] sm:$0xff] %v1016_v38 }
 0x2a0   : > { %1049 = vst [vmem:[#allocation2 + $0xe0] sm:$0xff] %v1017_v39  ;;  %1050 = vst [vmem:[#allocation2 + $0x90] sm:$0xff] %v1018_v44 }
 0x2a1   : > { %1051 = vst [vmem:[#allocation2 + $0x70] sm:$0xff] %v1019_v45  ;;  %1052 = vst [vmem:[#allocation2 + $0xc0] sm:$0xff] %v1020_v47 }
 0x2a2   : > { %1053 = vst [vmem:[#allocation2 + $0xa8] sm:$0xff] %v1021_v51  ;;  %1054 = vst [vmem:[#allocation2 + $0xd0] sm:$0xff] %v1022_v53 }
 0x2a3   : > { %1055 = vst [vmem:[#allocation2 + $0x10] sm:$0xff] %v1023_v54  ;;  %1056 = vst [vmem:[#allocation2 + $0x28] sm:$0xff] %v1024_v59 }
 0x2a4   : > { %1057 = vst [vmem:[#allocation2 + $0xa0] sm:$0xff] %v1025_v60  ;;  %1058 = vst [vmem:[#allocation2 + $0xf8] sm:$0xff] %v1026_v61 }
 0x2a5   : > { %1059 = vst [vmem:[#allocation2 + $0x20] sm:$0xff] %v1027_v0  ;;  %1060 = vst [vmem:[#allocation2 + $0x98] sm:$0xff] %v1028_v3 }
 0x2a6 PF: > { %p1817_p8 = scmp.ne.s32.totalorder %s3164_s27, 1 }
 0x2a8   : > { %1063 = sbr.rel (%p1817_p8) target bundleno = 722 (0x2d2), region = 48 }
 0x2ad   : > { %v1064_v6 = vld [vmem:[#allocation3 + $0x80] sm:$0xff]  ;;  %v1065_v7 = vld [vmem:[#allocation3 + $0xc8] sm:$0xff]  ;;  %v1067_v16 = vld [vmem:[#allocation3 + $0x78] sm:$0xff] }
 0x2ae   : > { %v1066_v11 = vld [vmem:[#allocation3 + $0xe8] sm:$0xff]  ;;  %v1096_v12 = vadd.f32 %v1064_v6, %v2538_v50  ;;  %v1097_v13 = vadd.f32 %v1065_v7, %v2544_v58  ;;  %v1069_v19 = vld [vmem:[#allocation3 + $0x90] sm:$0xff]  ;;  %v1099_v21 = vadd.f32 %v1067_v16, %v2556_v10  ;;  %v1070_v27 = vld [vmem:[#allocation3 + $0x58] sm:$0xff] }
 0x2af   : > { %v1098_v15 = vadd.f32 %v1066_v11, %v2550_v2  ;;  %v1068_v42 = vld [vmem:[#allocation3 + $0x8] sm:$0xff]  ;;  %v1101_v23 = vadd.f32 %v1069_v19, %v2568_v26  ;;  %v1072_v29 = vld [vmem:[#allocation3 + $0xd0] sm:$0xff]  ;;  %v1102_v50 = vadd.f32 %v1070_v27, %v2574_v34  ;;  %v1074_v37 = vld [vmem:[#allocation3 + $0x38] sm:$0xff] }
 0x2b0   : > { %v1100_v22 = vadd.f32 %v1068_v42, %v2562_v18  ;;  %v1071_v28 = vld [vmem:[#allocation3 + $0xa8] sm:$0xff]  ;;  %v1128_v31 = vmax.f32 %v1096_v12, 0.0  ;;  %v1129_v32 = vmax.f32 %v1097_v13, 0.0  ;;  %v1073_v58 = vld [vmem:[#allocation3 + $0xb0] sm:$0xff]  ;;  %v1075_v2 = vld [vmem:[#allocation3 + $0x40] sm:$0xff]  ;;  %v1131_v38 = vmax.f32 %v1099_v21, 0.0 }
 0x2b1   : > { %v1130_v35 = vmax.f32 %v1098_v15, 0.0  ;;  %v1133_v44 = vmax.f32 %v1101_v23, 0.0  ;;  %v1103_v10 = vadd.f32 %v1071_v28, %v2580_v41  ;;  %v1076_v45 = vld [vmem:[#allocation3 + $0xe0] sm:$0xff]  ;;  %v1078_v47 = vld [vmem:[#allocation3 + $0x18] sm:$0xff]  ;;  %v1134_v26 = vmax.f32 %v1102_v50, 0.0  ;;  %v1079_v54 = vld [vmem:[#allocation3 + $0x68] sm:$0xff] }
 0x2b2   : > { %v1132_v39 = vmax.f32 %v1100_v22, 0.0  ;;  %v1077_v18 = vld [vmem:[#allocation3 + $0x60] sm:$0xff]  ;;  %1160 = vst [vmem:[#allocation2 + $0xb0] sm:$0xff] %v1128_v31  ;;  %1192 = vst [vmem:[#allocation3 + $0x80] sm:$0xff] %v1128_v31  ;;  %v1104_v34 = vadd.f32 %v1072_v29, %v2535_v49  ;;  %v1105_v51 = vadd.f32 %v1073_v58, %v2541_v57  ;;  %v1106_v53 = vadd.f32 %v1074_v37, %v2547_v1  ;;  %v1080_v0 = vld [vmem:[#allocation3 + $0x10] sm:$0xff] }
 0x2b3   : > { %1161 = vst [vmem:[#allocation2] sm:$0xff] %v1129_v32  ;;  %1193 = vst [vmem:[#allocation3 + $0xc8] sm:$0xff] %v1129_v32  ;;  %v1135_v41 = vmax.f32 %v1103_v10, 0.0  ;;  %v1107_v59 = vadd.f32 %v1075_v2, %v2553_v9  ;;  %v1108_v60 = vadd.f32 %v1076_v45, %v2559_v17  ;;  %v1109_v61 = vadd.f32 %v1077_v18, %v2565_v25  ;;  %v1081_v49 = vld [vmem:[#allocation3 + $0x70] sm:$0xff]  ;;  %v1083_v11 = vld [vmem:[#allocation3 + $0xa0] sm:$0xff] }
 0x2b4   : > { %1162 = vst [vmem:[#allocation2 + $0xd8] sm:$0xff] %v1130_v35  ;;  %1194 = vst [vmem:[#allocation3 + $0xe8] sm:$0xff] %v1130_v35  ;;  %v1082_v3 = vld [vmem:[#allocation3 + $0x50] sm:$0xff]  ;;  %v1136_v57 = vmax.f32 %v1104_v34, 0.0  ;;  %v1137_v1 = vmax.f32 %v1105_v51, 0.0  ;;  %v1138_v6 = vmax.f32 %v1106_v53, 0.0  ;;  %v1110_v7 = vadd.f32 %v1078_v47, %v2571_v33 }
 0x2b5   : > { %1163 = vst [vmem:[#allocation2 + $0x18] sm:$0xff] %v1131_v38  ;;  %1195 = vst [vmem:[#allocation3 + $0x78] sm:$0xff] %v1131_v38  ;;  %v1084_v12 = vld [vmem:[#allocation3 + $0xd8] sm:$0xff]  ;;  %v1085_v13 = vld [vmem:[#allocation3 + $0x30] sm:$0xff]  ;;  %v1139_v9 = vmax.f32 %v1107_v59, 0.0  ;;  %v1140_v15 = vmax.f32 %v1108_v60, 0.0  ;;  %v1111_v25 = vadd.f32 %v1079_v54, %v2577_v40  ;;  %v1112_v33 = vadd.f32 %v1080_v0, %v2583_v46 }
 0x2b6   : > { %1164 = vst [vmem:[#allocation2 + $0x50] sm:$0xff] %v1132_v39  ;;  %1196 = vst [vmem:[#allocation3 + $0x8] sm:$0xff] %v1132_v39  ;;  %v1141_v17 = vmax.f32 %v1109_v61, 0.0  ;;  %v1086_v16 = vld [vmem:[#allocation3 + $0x20] sm:$0xff]  ;;  %v1142_v42 = vmax.f32 %v1110_v7, 0.0  ;;  %v1113_v19 = vadd.f32 %v1081_v49, %v2586_v52  ;;  %v1114_v21 = vadd.f32 %v1082_v3, %v2589_v56  ;;  %v1087_v22 = vld [vmem:[#allocation3 + $0xf0] sm:$0xff] }
 0x2b7   : > { %1165 = vst [vmem:[#allocation2 + $0x68] sm:$0xff] %v1133_v44  ;;  %1197 = vst [vmem:[#allocation3 + $0x90] sm:$0xff] %v1133_v44  ;;  %v1143_v40 = vmax.f32 %v1111_v25, 0.0  ;;  %v1115_v23 = vadd.f32 %v1083_v11, %v2592_v62  ;;  %v1116_v27 = vadd.f32 %v1084_v12, %v2595_v4  ;;  %v1117_v28 = vadd.f32 %v1085_v13, %v2598_v8  ;;  %v1088_v29 = vld [vmem:[#allocation3 + $0x88] sm:$0xff]  ;;  %v1090_v31 = vld [vmem:[#allocation3 + $0xf8] sm:$0xff] }
 0x2b8   : > { %1166 = vst [vmem:[#allocation2 + $0x30] sm:$0xff] %v1134_v26  ;;  %1198 = vst [vmem:[#allocation3 + $0x58] sm:$0xff] %v1134_v26  ;;  %v1089_v46 = vld [vmem:[#allocation3 + $0x48] sm:$0xff]  ;;  %v1144_v52 = vmax.f32 %v1112_v33, 0.0  ;;  %v1145_v56 = vmax.f32 %v1113_v19, 0.0  ;;  %v1146_v32 = vmax.f32 %v1114_v21, 0.0  ;;  %v1118_v35 = vadd.f32 %v1086_v16, %v2601_v14 }
 0x2b9   : > { %1167 = vst [vmem:[#allocation2 + $0x48] sm:$0xff] %v1135_v41  ;;  %1199 = vst [vmem:[#allocation3 + $0xa8] sm:$0xff] %v1135_v41  ;;  %v1091_v50 = vld [vmem:[#allocation3 + $0xc0] sm:$0xff]  ;;  %v1092_v58 = vld [vmem:[#allocation3 + $0xb8] sm:$0xff]  ;;  %v1147_v62 = vmax.f32 %v1115_v23, 0.0  ;;  %v1148_v2 = vmax.f32 %v1116_v27, 0.0  ;;  %v1119_v8 = vadd.f32 %v1087_v22, %v2604_v20  ;;  %v1120_v14 = vadd.f32 %v1088_v29, %v2607_v24 }
 0x2ba   : > { %1168 = vst [vmem:[#allocation2 + $0x80] sm:$0xff] %v1136_v57  ;;  %1200 = vst [vmem:[#allocation3 + $0xd0] sm:$0xff] %v1136_v57  ;;  %v1093_v37 = vld [vmem:[#allocation3] sm:$0xff]  ;;  %v1149_v4 = vmax.f32 %v1117_v28, 0.0  ;;  %v1094_v38 = vld [vmem:[#allocation3 + $0x28] sm:$0xff]  ;;  %v1150_v39 = vmax.f32 %v1118_v35, 0.0  ;;  %v1121_v44 = vadd.f32 %v1089_v46, %v2610_v30  ;;  %v1122_v10 = vadd.f32 %v1090_v31, %v2613_v36 }
 0x2bb   : > { %1169 = vst [vmem:[#allocation2 + $0x88] sm:$0xff] %v1137_v1  ;;  %1201 = vst [vmem:[#allocation3 + $0xb0] sm:$0xff] %v1137_v1  ;;  %v1095_v45 = vld [vmem:[#allocation3 + $0x98] sm:$0xff]  ;;  %v1151_v20 = vmax.f32 %v1119_v8, 0.0  ;;  %v1123_v18 = vadd.f32 %v1091_v50, %v2616_v43  ;;  %v1124_v47 = vadd.f32 %v1092_v58, %v2619_v48  ;;  %v1125_v26 = vadd.f32 %v1093_v37, %v2622_v55 }
 0x2bc   : > { %1170 = vst [vmem:[#allocation2 + $0xe8] sm:$0xff] %v1138_v6  ;;  %1202 = vst [vmem:[#allocation3 + $0x38] sm:$0xff] %v1138_v6  ;;  %v1152_v24 = vmax.f32 %v1120_v14, 0.0  ;;  %v1153_v30 = vmax.f32 %v1121_v44, 0.0  ;;  %v1154_v34 = vmax.f32 %v1122_v10, 0.0  ;;  %v1126_v36 = vadd.f32 %v1094_v38, %v2625_v63 }
 0x2bd   : > { %1171 = vst [vmem:[#allocation2 + $0xb8] sm:$0xff] %v1139_v9  ;;  %1203 = vst [vmem:[#allocation3 + $0x40] sm:$0xff] %v1139_v9  ;;  %v1155_v51 = vmax.f32 %v1123_v18, 0.0  ;;  %v1156_v53 = vmax.f32 %v1124_v47, 0.0  ;;  %v1157_v54 = vmax.f32 %v1125_v26, 0.0  ;;  %v1127_v41 = vadd.f32 %v1095_v45, %v2628_v5 }
 0x2be   : > { %1172 = vst [vmem:[#allocation2 + $0x60] sm:$0xff] %v1140_v15  ;;  %1204 = vst [vmem:[#allocation3 + $0xe0] sm:$0xff] %v1140_v15  ;;  %v1158_v43 = vmax.f32 %v1126_v36, 0.0 }
 0x2bf   : > { %1173 = vst [vmem:[#allocation2 + $0xf0] sm:$0xff] %v1141_v17  ;;  %1205 = vst [vmem:[#allocation3 + $0x60] sm:$0xff] %v1141_v17  ;;  %v1159_v48 = vmax.f32 %v1127_v41, 0.0 }
 0x2c0   : > { %1174 = vst [vmem:[#allocation2 + $0x8] sm:$0xff] %v1142_v42  ;;  %1206 = vst [vmem:[#allocation3 + $0x18] sm:$0xff] %v1142_v42 }
 0x2c1   : > { %1175 = vst [vmem:[#allocation2 + $0x78] sm:$0xff] %v1143_v40  ;;  %1207 = vst [vmem:[#allocation3 + $0x68] sm:$0xff] %v1143_v40 }
 0x2c2   : > { %1176 = vst [vmem:[#allocation2 + $0x38] sm:$0xff] %v1144_v52  ;;  %1208 = vst [vmem:[#allocation3 + $0x10] sm:$0xff] %v1144_v52 }
 0x2c3   : > { %1177 = vst [vmem:[#allocation2 + $0x58] sm:$0xff] %v1145_v56  ;;  %1209 = vst [vmem:[#allocation3 + $0x70] sm:$0xff] %v1145_v56 }
 0x2c4   : > { %1178 = vst [vmem:[#allocation2 + $0x40] sm:$0xff] %v1146_v32  ;;  %1210 = vst [vmem:[#allocation3 + $0x50] sm:$0xff] %v1146_v32 }
 0x2c5   : > { %1179 = vst [vmem:[#allocation2 + $0xc8] sm:$0xff] %v1147_v62  ;;  %1211 = vst [vmem:[#allocation3 + $0xa0] sm:$0xff] %v1147_v62 }
 0x2c6   : > { %1180 = vst [vmem:[#allocation2 + $0xe0] sm:$0xff] %v1148_v2  ;;  %1212 = vst [vmem:[#allocation3 + $0xd8] sm:$0xff] %v1148_v2 }
 0x2c7   : > { %1181 = vst [vmem:[#allocation2 + $0x90] sm:$0xff] %v1149_v4  ;;  %1213 = vst [vmem:[#allocation3 + $0x30] sm:$0xff] %v1149_v4 }
 0x2c8   : > { %1182 = vst [vmem:[#allocation2 + $0x70] sm:$0xff] %v1150_v39  ;;  %1214 = vst [vmem:[#allocation3 + $0x20] sm:$0xff] %v1150_v39 }
 0x2c9   : > { %1183 = vst [vmem:[#allocation2 + $0xc0] sm:$0xff] %v1151_v20  ;;  %1215 = vst [vmem:[#allocation3 + $0xf0] sm:$0xff] %v1151_v20 }
 0x2ca   : > { %1184 = vst [vmem:[#allocation2 + $0xa8] sm:$0xff] %v1152_v24  ;;  %1216 = vst [vmem:[#allocation3 + $0x88] sm:$0xff] %v1152_v24 }
 0x2cb   : > { %1185 = vst [vmem:[#allocation2 + $0xd0] sm:$0xff] %v1153_v30  ;;  %1217 = vst [vmem:[#allocation3 + $0x48] sm:$0xff] %v1153_v30 }
 0x2cc   : > { %1186 = vst [vmem:[#allocation2 + $0x10] sm:$0xff] %v1154_v34  ;;  %1218 = vst [vmem:[#allocation3 + $0xf8] sm:$0xff] %v1154_v34 }
 0x2cd   : > { %1187 = vst [vmem:[#allocation2 + $0x28] sm:$0xff] %v1155_v51  ;;  %1219 = vst [vmem:[#allocation3 + $0xc0] sm:$0xff] %v1155_v51 }
 0x2ce   : > { %1188 = vst [vmem:[#allocation2 + $0xa0] sm:$0xff] %v1156_v53  ;;  %1220 = vst [vmem:[#allocation3 + $0xb8] sm:$0xff] %v1156_v53 }
 0x2cf   : > { %1189 = vst [vmem:[#allocation2 + $0xf8] sm:$0xff] %v1157_v54  ;;  %1221 = vst [vmem:[#allocation3] sm:$0xff] %v1157_v54 }
 0x2d0   : > { %1190 = vst [vmem:[#allocation2 + $0x20] sm:$0xff] %v1158_v43  ;;  %1222 = vst [vmem:[#allocation3 + $0x28] sm:$0xff] %v1158_v43 }
 0x2d1   : > { %1191 = vst [vmem:[#allocation2 + $0x98] sm:$0xff] %v1159_v48  ;;  %1223 = vst [vmem:[#allocation3 + $0x98] sm:$0xff] %v1159_v48 }
 0x2d2 PF: > { %p1818_p9 = scmp.ne.s32.totalorder %s2295_s16, 3 }
 0x2d4   : > { %1227 = sbr.rel (%p1818_p9) target bundleno = 981 (0x3d5), region = 52 }
 0x2d9   : > { %v2697_v55 = vld [vmem:[#allocation2 + $0xd8] sm:$0xff]  ;;  %v2699_v63 = vld [vmem:[#allocation2 + $0xb0] sm:$0xff]  ;;  %v2707_v61 = vld [vmem:[#allocation2] sm:$0xff] }
 0x2da   : > { %v2701_v5 = vld [vmem:[#allocation2 + $0x18] sm:$0xff]  ;;  %v1262_v59 = vmul.f32 %v2697_v55, %v2697_v55  ;;  %v1260_v60 = vmul.f32 %v2699_v63, %v2699_v63  ;;  %v1261_v49 = vmul.f32 %v2707_v61, %v2707_v61  ;;  %v2713_v3 = vld [vmem:[#allocation2 + $0x68] sm:$0xff]  ;;  %v2715_v57 = vld [vmem:[#allocation2 + $0x50] sm:$0xff] }
 0x2db   : > { %v1263_v0 = vmul.f32 %v2701_v5, %v2701_v5  ;;  %v1265_v1 = vmul.f32 %v2713_v3, %v2713_v3  ;;  %v1264_v6 = vmul.f32 %v2715_v57, %v2715_v57  ;;  %v2721_v7 = vld [vmem:[#allocation2 + $0x48] sm:$0xff]  ;;  %v2723_v11 = vld [vmem:[#allocation2 + $0x30] sm:$0xff]  ;;  %v2731_v15 = vld [vmem:[#allocation2 + $0x80] sm:$0xff] }
 0x2dc   : > { %1296 = vadd.xlane.f32.xlu1 %v1262_v59  ;;  %1292 = vadd.xlane.f32.xlu0 %v1260_v60  ;;  %v1267_v12 = vmul.f32 %v2721_v7, %v2721_v7  ;;  %v1266_v13 = vmul.f32 %v2723_v11, %v2723_v11  ;;  %v2729_v9 = vld [vmem:[#allocation2 + $0x88] sm:$0xff]  ;;  %v1268_v25 = vmul.f32 %v2731_v15, %v2731_v15  ;;  %v2737_v16 = vld [vmem:[#allocation2 + $0xb8] sm:$0xff]  ;;  %v2745_v21 = vld [vmem:[#allocation2 + $0xf0] sm:$0xff] }
 0x2dd   : > { %v1269_v17 = vmul.f32 %v2729_v9, %v2729_v9  ;;  %v2739_v42 = vld [vmem:[#allocation2 + $0xe8] sm:$0xff]  ;;  %v1271_v33 = vmul.f32 %v2737_v16, %v2737_v16  ;;  %v2747_v22 = vld [vmem:[#allocation2 + $0x60] sm:$0xff]  ;;  %v1273_v40 = vmul.f32 %v2745_v21, %v2745_v21  ;;  %v2753_v27 = vld [vmem:[#allocation2 + $0x78] sm:$0xff] }
 0x2de   : > { %v1270_v19 = vmul.f32 %v2739_v42, %v2739_v42  ;;  %v1272_v23 = vmul.f32 %v2747_v22, %v2747_v22  ;;  %v2755_v28 = vld [vmem:[#allocation2 + $0x8] sm:$0xff]  ;;  %v1275_v29 = vmul.f32 %v2753_v27, %v2753_v27  ;;  %v2761_v31 = vld [vmem:[#allocation2 + $0x58] sm:$0xff]  ;;  %v2771_v50 = vld [vmem:[#allocation2 + $0x40] sm:$0xff] }
 0x2df   : > { %v1274_v46 = vmul.f32 %v2755_v28, %v2755_v28  ;;  %v2763_v52 = vld [vmem:[#allocation2 + $0x38] sm:$0xff]  ;;  %v1277_v56 = vmul.f32 %v2761_v31, %v2761_v31  ;;  %v2769_v35 = vld [vmem:[#allocation2 + $0xc8] sm:$0xff]  ;;  %v1278_v37 = vmul.f32 %v2771_v50, %v2771_v50  ;;  %v2777_v62 = vld [vmem:[#allocation2 + $0x90] sm:$0xff] }
 0x2e0   : > { %1298 = vadd.xlane.f32.xlu1 %v1263_v0  ;;  %1294 = vadd.xlane.f32.xlu0 %v1261_v49  ;;  %v1276_v32 = vmul.f32 %v2763_v52, %v2763_v52  ;;  %v1279_v58 = vmul.f32 %v2769_v35, %v2769_v35  ;;  %v2779_v2 = vld [vmem:[#allocation2 + $0xe0] sm:$0xff]  ;;  %v1281_v4 = vmul.f32 %v2777_v62, %v2777_v62  ;;  %v2787_v39 = vld [vmem:[#allocation2 + $0x70] sm:$0xff]  ;;  %v2795_v45 = vld [vmem:[#allocation2 + $0xa8] sm:$0xff] }
 0x2e1   : > { %v1280_v8 = vmul.f32 %v2779_v2, %v2779_v2  ;;  %v2785_v38 = vld [vmem:[#allocation2 + $0xc0] sm:$0xff]  ;;  %v1282_v44 = vmul.f32 %v2787_v39, %v2787_v39  ;;  %v2793_v10 = vld [vmem:[#allocation2 + $0xd0] sm:$0xff]  ;;  %v1284_v18 = vmul.f32 %v2795_v45, %v2795_v45  ;;  %v2801_v47 = vld [vmem:[#allocation2 + $0x28] sm:$0xff] }
 0x2e2   : > { %v1283_v14 = vmul.f32 %v2785_v38, %v2785_v38  ;;  %v1285_v20 = vmul.f32 %v2793_v10, %v2793_v10  ;;  %v2803_v26 = vld [vmem:[#allocation2 + $0x10] sm:$0xff]  ;;  %v1287_v24 = vmul.f32 %v2801_v47, %v2801_v47  ;;  %v2809_v34 = vld [vmem:[#allocation2 + $0xf8] sm:$0xff]  ;;  %v2811_v36 = vld [vmem:[#allocation2 + $0xa0] sm:$0xff] }
 0x2e3   : > { %v1286_v30 = vmul.f32 %v2803_v26, %v2803_v26  ;;  %v1289_v51 = vmul.f32 %v2809_v34, %v2809_v34  ;;  %v1288_v53 = vmul.f32 %v2811_v36, %v2811_v36  ;;  %v2817_v54 = vld [vmem:[#allocation2 + $0x98] sm:$0xff]  ;;  %v2819_v41 = vld [vmem:[#allocation2 + $0x20] sm:$0xff] }
 0x2e4   : > { %1302 = vadd.xlane.f32.xlu1 %v1265_v1  ;;  %1300 = vadd.xlane.f32.xlu0 %v1264_v6  ;;  %v1291_v43 = vmul.f32 %v2817_v54, %v2817_v54  ;;  %v1290_v48 = vmul.f32 %v2819_v41, %v2819_v41 }
 0x2e8   : > { %1306 = vadd.xlane.f32.xlu1 %v1267_v12  ;;  %1304 = vadd.xlane.f32.xlu0 %v1266_v13 }
 0x2ec   : > { %1310 = vadd.xlane.f32.xlu1 %v1269_v17  ;;  %1308 = vadd.xlane.f32.xlu0 %v1268_v25 }
 0x2f0   : > { %1314 = vadd.xlane.f32.xlu1 %v1271_v33  ;;  %1312 = vadd.xlane.f32.xlu0 %v1270_v19 }
 0x2f4   : > { %1318 = vadd.xlane.f32.xlu1 %v1273_v40  ;;  %1316 = vadd.xlane.f32.xlu0 %v1272_v23 }
 0x2f8   : > { %1322 = vadd.xlane.f32.xlu1 %v1275_v29  ;;  %1320 = vadd.xlane.f32.xlu0 %v1274_v46 }
 0x2fc   : > { %1326 = vadd.xlane.f32.xlu1 %v1277_v56  ;;  %1324 = vadd.xlane.f32.xlu0 %v1276_v32 }
 0x300   : > { %1330 = vadd.xlane.f32.xlu1 %v1279_v58  ;;  %1328 = vadd.xlane.f32.xlu0 %v1278_v37 }
 0x304   : > { %1334 = vadd.xlane.f32.xlu1 %v1281_v4  ;;  %1332 = vadd.xlane.f32.xlu0 %v1280_v8 }
 0x308   : > { %1338 = vadd.xlane.f32.xlu1 %v1283_v14  ;;  %1336 = vadd.xlane.f32.xlu0 %v1282_v44 }
 0x30c   : > { %1342 = vadd.xlane.f32.xlu1 %v1285_v20  ;;  %1340 = vadd.xlane.f32.xlu0 %v1284_v18 }
 0x310   : > { %1346 = vadd.xlane.f32.xlu1 %v1287_v24  ;;  %1344 = vadd.xlane.f32.xlu0 %v1286_v30 }
 0x314   : > { %1350 = vadd.xlane.f32.xlu1 %v1289_v51  ;;  %1348 = vadd.xlane.f32.xlu0 %v1288_v53 }
 0x318   : > { %1354 = vadd.xlane.f32.xlu1 %v1291_v43  ;;  %1352 = vadd.xlane.f32.xlu0 %v1290_v48 }
 0x365   : > { %v1297_v59 = vpop.xlane.xlu1 %1296  ;;  %v1293_v60 = vpop.xlane.xlu0 %1292 }
 0x366   : > { %2097 = vrsqrt.f32 %v1297_v59  ;;  %vm1372_vm0 = vcmp.eq.f32.partialorder %v1297_v59, inf  ;;  %vm1374_vm1 = vcmp.eq.f32.partialorder %v1297_v59, 0.0  ;;  %v1375_v19 = vand.u32 2147483648, %v1297_v59 }
 0x367   : > { %2099 = vrsqrt.f32 %v1293_v60  ;;  %vm1358_vm2 = vcmp.eq.f32.partialorder %v1293_v60, inf  ;;  %vm1360_vm3 = vcmp.eq.f32.partialorder %v1293_v60, 0.0  ;;  %v1361_v23 = vand.u32 2147483648, %v1293_v60 }
 0x369   : > { %v1299_v0 = vpop.xlane.xlu1 %1298  ;;  %v1295_v49 = vpop.xlane.xlu0 %1294 }
 0x36a   : > { %2101 = vrsqrt.f32 %v1299_v0  ;;  %vm1379_vm4 = vcmp.eq.f32.partialorder %v1299_v0, inf  ;;  %vm1381_vm5 = vcmp.eq.f32.partialorder %v1299_v0, 0.0  ;;  %v1382_v32 = vand.u32 2147483648, %v1299_v0 }
 0x36b   : > { %2103 = vrsqrt.f32 %v1295_v49  ;;  %vm1365_vm6 = vcmp.eq.f32.partialorder %v1295_v49, inf  ;;  %vm1367_vm7 = vcmp.eq.f32.partialorder %v1295_v49, 0.0  ;;  %v1368_v18 = vand.u32 2147483648, %v1295_v49 }
 0x36d   : > { %v2825_v1 = vpop.xlane.xlu1 %1302  ;;  %v2827_v6 = vpop.xlane.xlu0 %1300 }
 0x36e   : > { %2105 = vrsqrt.f32 %v2825_v1  ;;  %vm1393_vm8 = vcmp.eq.f32.partialorder %v2825_v1, inf  ;;  %vm1395_vm9 = vcmp.eq.f32.partialorder %v2825_v1, 0.0  ;;  %v1396_v48 = vand.u32 2147483648, %v2825_v1 }
 0x36f   : > { %2107 = vrsqrt.f32 %v2827_v6  ;;  %vm1386_vm10 = vcmp.eq.f32.partialorder %v2827_v6, inf  ;;  %vm1388_vm11 = vcmp.eq.f32.partialorder %v2827_v6, 0.0 }
 0x371   : > { %v2831_v12 = vpop.xlane.xlu1 %1306  ;;  %v2833_v13 = vpop.xlane.xlu0 %1304 }
 0x372   : > { %2109 = vrsqrt.f32 %v2831_v12  ;;  %vm1407_vm12 = vcmp.eq.f32.partialorder %v2831_v12, inf  ;;  %vm1409_vm13 = vcmp.eq.f32.partialorder %v2831_v12, 0.0  ;;  %vm1400_vm14 = vcmp.eq.f32.partialorder %v2833_v13, inf }
 0x373   : > { %v2098_v17 = vpop.eup %2097  ;;  %2111 = vrsqrt.f32 %v2833_v13  ;;  %vm1402_vm15 = vcmp.eq.f32.partialorder %v2833_v13, 0.0 }
 0x374   : > { %v2100_v25 = vpop.eup %2099  ;;  %v1371_v33 = vmul.f32 %v2098_v17, %v1297_v59 }
 0x375   : > { %v1357_v40 = vmul.f32 %v2100_v25, %v1293_v60  ;;  %v2837_v29 = vpop.xlane.xlu1 %1310  ;;  %v2839_v46 = vpop.xlane.xlu0 %1308 }
 0x376   : > { %v1373_v56 = vsel %vm1372_vm0, %v1297_v59, %v1371_v33  ;;  %2113 = vrsqrt.f32 %v2837_v29  ;;  %vm1421_vm0 = vcmp.eq.f32.partialorder %v2837_v29, inf }
 0x377   : > { %v2102_v58 = vpop.eup %2101  ;;  %v1376_v37 = vsel %vm1374_vm1, %v1375_v19, %v1373_v56  ;;  %v1359_v4 = vsel %vm1358_vm2, %v1293_v60, %v1357_v40  ;;  %2115 = vrsqrt.f32 %v2839_v46  ;;  %vm1423_vm1 = vcmp.eq.f32.partialorder %v2837_v29, 0.0 }
 0x378   : > { %v2104_v8 = vpop.eup %2103  ;;  %v1582_v14 = vmax.f32 %v1376_v37, 1e-12  ;;  %v1362_v44 = vsel %vm1360_vm3, %v1361_v23, %v1359_v4  ;;  %v1378_v20 = vmul.f32 %v2102_v58, %v1299_v0  ;;  %v1389_v58 = vand.u32 2147483648, %v2827_v6 }
 0x379   : > { %v1580_v24 = vmax.f32 %v1362_v44, 1e-12  ;;  %v1364_v30 = vmul.f32 %v2104_v8, %v1295_v49  ;;  %v2847_v51 = vpop.xlane.xlu1 %1314  ;;  %v2849_v53 = vpop.xlane.xlu0 %1312  ;;  %vm1414_vm2 = vcmp.eq.f32.partialorder %v2839_v46, inf  ;;  %vm1416_vm3 = vcmp.eq.f32.partialorder %v2839_v46, 0.0 }
 0x37a   : > { %2117 = vrcp.f32 %v1582_v14  ;;  %v1380_v43 = vsel %vm1379_vm4, %v1299_v0, %v1378_v20  ;;  %v1410_v14 = vand.u32 2147483648, %v2831_v12  ;;  %vm1435_vm4 = vcmp.eq.f32.partialorder %v2847_v51, inf }
 0x37b   : > { %v2106_v59 = vpop.eup %2105  ;;  %2119 = vrcp.f32 %v1580_v24  ;;  %v1383_v60 = vsel %vm1381_vm5, %v1382_v32, %v1380_v43  ;;  %v1366_v17 = vsel %vm1365_vm6, %v1295_v49, %v1364_v30  ;;  %vm1437_vm5 = vcmp.eq.f32.partialorder %v2847_v51, 0.0 }
 0x37c   : > { %v2108_v25 = vpop.eup %2107  ;;  %v1583_v33 = vmax.f32 %v1383_v60, 1e-12  ;;  %v1369_v19 = vsel %vm1367_vm7, %v1368_v18, %v1366_v17  ;;  %v1392_v40 = vmul.f32 %v2106_v59, %v2825_v1  ;;  %2121 = vrsqrt.f32 %v2847_v51 }
 0x37d   : > { %v1581_v23 = vmax.f32 %v1369_v19, 1e-12  ;;  %v1385_v56 = vmul.f32 %v2108_v25, %v2827_v6  ;;  %2123 = vrsqrt.f32 %v2849_v53  ;;  %v2863_v0 = vpop.xlane.xlu1 %1318  ;;  %v2865_v32 = vpop.xlane.xlu0 %1316  ;;  %v1403_v59 = vand.u32 2147483648, %v2833_v13 }
 0x37e   : > { %2125 = vrcp.f32 %v1583_v33  ;;  %v1394_v49 = vsel %vm1393_vm8, %v2825_v1, %v1392_v40  ;;  %vm1428_vm6 = vcmp.eq.f32.partialorder %v2849_v53, inf  ;;  %vm1430_vm7 = vcmp.eq.f32.partialorder %v2849_v53, 0.0 }
 0x37f   : > { %v2110_v37 = vpop.eup %2109  ;;  %2127 = vrcp.f32 %v1581_v23  ;;  %v1397_v4 = vsel %vm1395_vm9, %v1396_v48, %v1394_v49  ;;  %v1387_v8 = vsel %vm1386_vm10, %v2827_v6, %v1385_v56  ;;  %vm1449_vm8 = vcmp.eq.f32.partialorder %v2863_v0, inf }
 0x380   : > { %v2112_v44 = vpop.eup %2111  ;;  %v1585_v20 = vmax.f32 %v1397_v4, 1e-12  ;;  %v1390_v18 = vsel %vm1388_vm11, %v1389_v58, %v1387_v8  ;;  %v1406_v24 = vmul.f32 %v2110_v37, %v2831_v12  ;;  %2129 = vrsqrt.f32 %v2863_v0 }
 0x381   : > { %v1584_v30 = vmax.f32 %v1390_v18, 1e-12  ;;  %v1399_v43 = vmul.f32 %v2112_v44, %v2833_v13  ;;  %v2885_v1 = vpop.xlane.xlu1 %1322  ;;  %v2887_v48 = vpop.xlane.xlu0 %1320  ;;  %v1424_v58 = vand.u32 2147483648, %v2837_v29  ;;  %v1417_v4 = vand.u32 2147483648, %v2839_v46 }
 0x382   : > { %2131 = vrcp.f32 %v1585_v20  ;;  %v1408_v6 = vsel %vm1407_vm12, %v2831_v12, %v1406_v24  ;;  %vm1451_vm9 = vcmp.eq.f32.partialorder %v2863_v0, 0.0  ;;  %vm1442_vm10 = vcmp.eq.f32.partialorder %v2865_v32, inf }
 0x383   : > { %v2114_v60 = vpop.eup %2113  ;;  %2133 = vrcp.f32 %v1584_v30  ;;  %v1411_v17 = vsel %vm1409_vm13, %v1410_v14, %v1408_v6  ;;  %v1401_v25 = vsel %vm1400_vm14, %v2833_v13, %v1399_v43  ;;  %vm1444_vm11 = vcmp.eq.f32.partialorder %v2865_v32, 0.0 }
 0x384   : > { %v2116_v33 = vpop.eup %2115  ;;  %v1587_v19 = vmax.f32 %v1411_v17, 1e-12  ;;  %v1404_v40 = vsel %vm1402_vm15, %v1403_v59, %v1401_v25  ;;  %v1420_v23 = vmul.f32 %v2114_v60, %v2837_v29  ;;  %2135 = vrsqrt.f32 %v2865_v32 }
 0x385   : > { %v1586_v56 = vmax.f32 %v1404_v40, 1e-12  ;;  %v1413_v49 = vmul.f32 %v2116_v33, %v2839_v46  ;;  %2137 = vrsqrt.f32 %v2885_v1  ;;  %v2903_v12 = vpop.xlane.xlu1 %1326  ;;  %v2905_v37 = vpop.xlane.xlu0 %1324  ;;  %v1438_v17 = vand.u32 2147483648, %v2847_v51 }
 0x386   : > { %2139 = vrcp.f32 %v1587_v19  ;;  %v1422_v13 = vsel %vm1421_vm0, %v2837_v29, %v1420_v23  ;;  %v1431_v33 = vand.u32 2147483648, %v2849_v53  ;;  %vm1463_vm12 = vcmp.eq.f32.partialorder %v2885_v1, inf }
 0x387   : > { %v2118_v8 = vpop.eup %2117  ;;  %2141 = vrcp.f32 %v1586_v56  ;;  %v1425_v14 = vsel %vm1423_vm1, %v1424_v58, %v1422_v13  ;;  %v1415_v44 = vsel %vm1414_vm2, %v2839_v46, %v1413_v49  ;;  %vm1465_vm13 = vcmp.eq.f32.partialorder %v2885_v1, 0.0 }
 0x388   : > { %v2120_v20 = vpop.eup %2119  ;;  %v1617_v18 = vmul.f32 %v2118_v8, %v2697_v55  ;;  %v1589_v24 = vmax.f32 %v1425_v14, 1e-12  ;;  %v1418_v30 = vsel %vm1416_vm3, %v1417_v4, %v1415_v44  ;;  %2143 = vrsqrt.f32 %v2887_v48 }
 0x389   : > { %v2122_v43 = vpop.eup %2121  ;;  %v1613_v6 = vmul.f32 %v2120_v20, %v2699_v63  ;;  %v1588_v59 = vmax.f32 %v1418_v30, 1e-12  ;;  %v2921_v29 = vpop.xlane.xlu1 %1330  ;;  %vm1456_vm14 = vcmp.eq.f32.partialorder %v2887_v48, inf  ;;  %vm1458_vm15 = vcmp.eq.f32.partialorder %v2887_v48, 0.0 }
 0x38a   : > { %v2923_v60 = vpop.xlane.xlu0 %1328  ;;  %v2124_v46 = vpop.eup %2123  ;;  %1678 = vst [vmem:[#allocation4 + $0x10] sm:$0xff] %v1617_v18  ;;  %2145 = vrcp.f32 %v1589_v24  ;;  %v1434_v55 = vmul.f32 %v2122_v43, %v2847_v51  ;;  %vm1477_vm0 = vcmp.eq.f32.partialorder %v2903_v12, inf  ;;  %vm1479_vm1 = vcmp.eq.f32.partialorder %v2903_v12, 0.0 }
 0x38b   : > { %v2126_v25 = vpop.eup %2125  ;;  %1676 = vst [vmem:[#allocation4] sm:$0xff] %v1613_v6  ;;  %2147 = vrcp.f32 %v1588_v59  ;;  %v1427_v63 = vmul.f32 %v2124_v46, %v2849_v53  ;;  %v1445_v59 = vand.u32 2147483648, %v2865_v32  ;;  %vm1470_vm2 = vcmp.eq.f32.partialorder %v2905_v37, inf }
 0x38c   : > { %v2128_v19 = vpop.eup %2127  ;;  %v1619_v40 = vmul.f32 %v2126_v25, %v2701_v5  ;;  %v1436_v23 = vsel %vm1435_vm4, %v2847_v51, %v1434_v55  ;;  %2149 = vrsqrt.f32 %v2903_v12  ;;  %vm1472_vm3 = vcmp.eq.f32.partialorder %v2905_v37, 0.0 }
 0x38d   : > { %v2130_v56 = vpop.eup %2129  ;;  %v1615_v58 = vmul.f32 %v2128_v19, %v2707_v61  ;;  %v1439_v49 = vsel %vm1437_vm5, %v1438_v17, %v1436_v23  ;;  %v1429_v13 = vsel %vm1428_vm6, %v2849_v53, %v1427_v63  ;;  %2151 = vrsqrt.f32 %v2905_v37  ;;  %v2942_v4 = vpop.xlane.xlu1 %1334 }
 0x38e   : > { %1679 = vst [vmem:[#allocation4 + $0x18] sm:$0xff] %v1619_v40  ;;  %v1591_v5 = vmax.f32 %v1439_v49, 1e-12  ;;  %v1432_v8 = vsel %vm1430_vm7, %v1431_v33, %v1429_v13  ;;  %v1448_v14 = vmul.f32 %v2130_v56, %v2863_v0  ;;  %v1452_v61 = vand.u32 2147483648, %v2863_v0  ;;  %v2949_v51 = vpop.xlane.xlu0 %1332 }
 0x38f   : > { %v2132_v44 = vpop.eup %2131  ;;  %1677 = vst [vmem:[#allocation4 + $0x8] sm:$0xff] %v1615_v58  ;;  %v1590_v20 = vmax.f32 %v1432_v8, 1e-12  ;;  %2153 = vrsqrt.f32 %v2921_v29  ;;  %v1459_v8 = vand.u32 2147483648, %v2887_v48  ;;  %vm1491_vm4 = vcmp.eq.f32.partialorder %v2921_v29, inf }
 0x390   : > { %v2134_v53 = vpop.eup %2133  ;;  %v1623_v18 = vmul.f32 %v2132_v44, %v2713_v3  ;;  %2155 = vrcp.f32 %v1591_v5  ;;  %v1450_v24 = vsel %vm1449_vm8, %v2863_v0, %v1448_v14  ;;  %v1466_v0 = vand.u32 2147483648, %v2885_v1 }
 0x391   : > { %v2136_v30 = vpop.eup %2135  ;;  %v1621_v43 = vmul.f32 %v2134_v53, %v2715_v57  ;;  %2157 = vrcp.f32 %v1590_v20  ;;  %v1453_v6 = vsel %vm1451_vm9, %v1452_v61, %v1450_v24  ;;  %v2963_v17 = vpop.xlane.xlu1 %1338  ;;  %v1480_v20 = vand.u32 2147483648, %v2903_v12 }
 0x392   : > { %v2138_v46 = vpop.eup %2137  ;;  %1681 = vst [vmem:[#allocation4 + $0x28] sm:$0xff] %v1623_v18  ;;  %v1593_v55 = vmax.f32 %v1453_v6, 1e-12  ;;  %v1441_v3 = vmul.f32 %v2136_v30, %v2865_v32  ;;  %2159 = vrsqrt.f32 %v2923_v60  ;;  %vm1493_vm5 = vcmp.eq.f32.partialorder %v2921_v29, 0.0 }
 0x393   : > { %v2140_v25 = vpop.eup %2139  ;;  %1680 = vst [vmem:[#allocation4 + $0x20] sm:$0xff] %v1621_v43  ;;  %v1462_v57 = vmul.f32 %v2138_v46, %v2885_v1  ;;  %2161 = vrsqrt.f32 %v2942_v4  ;;  %vm1484_vm6 = vcmp.eq.f32.partialorder %v2923_v60, inf  ;;  %vm1486_vm7 = vcmp.eq.f32.partialorder %v2923_v60, 0.0 }
 0x394   : > { %v2142_v63 = vpop.eup %2141  ;;  %v1627_v33 = vmul.f32 %v2140_v25, %v2721_v7  ;;  %2163 = vrcp.f32 %v1593_v55  ;;  %v1443_v19 = vsel %vm1442_vm10, %v2865_v32, %v1441_v3  ;;  %v2981_v7 = vpop.xlane.xlu0 %1336  ;;  %v1494_v55 = vand.u32 2147483648, %v2921_v29 }
 0x395   : > { %v2144_v40 = vpop.eup %2143  ;;  %v1625_v23 = vmul.f32 %v2142_v63, %v2723_v11  ;;  %v1446_v56 = vsel %vm1444_vm11, %v1445_v59, %v1443_v19  ;;  %v1464_v58 = vsel %vm1463_vm12, %v2885_v1, %v1462_v57  ;;  %2165 = vrsqrt.f32 %v2949_v51  ;;  %v2995_v61 = vpop.xlane.xlu1 %1342 }
 0x396   : > { %1683 = vst [vmem:[#allocation4 + $0x38] sm:$0xff] %v1627_v33  ;;  %v1592_v49 = vmax.f32 %v1446_v56, 1e-12  ;;  %v1467_v13 = vsel %vm1465_vm13, %v1466_v0, %v1464_v58  ;;  %v1455_v5 = vmul.f32 %v2144_v40, %v2887_v48  ;;  %vm1505_vm8 = vcmp.eq.f32.partialorder %v2942_v4, inf }
 0x397   : > { %v2146_v11 = vpop.eup %2145  ;;  %1682 = vst [vmem:[#allocation4 + $0x30] sm:$0xff] %v1625_v23  ;;  %v1595_v32 = vmax.f32 %v1467_v13, 1e-12  ;;  %vm1507_vm9 = vcmp.eq.f32.partialorder %v2942_v4, 0.0  ;;  %vm1498_vm10 = vcmp.eq.f32.partialorder %v2949_v51, inf  ;;  %vm1500_vm11 = vcmp.eq.f32.partialorder %v2949_v51, 0.0 }
 0x398   : > { %v2148_v14 = vpop.eup %2147  ;;  %v1631_v44 = vmul.f32 %v2146_v11, %v2729_v9  ;;  %2167 = vrcp.f32 %v1592_v49  ;;  %v1457_v1 = vsel %vm1456_vm14, %v2887_v48, %v1455_v5  ;;  %v3008_v48 = vpop.xlane.xlu0 %1340  ;;  %v1487_v5 = vand.u32 2147483648, %v2923_v60 }
 0x399   : > { %v2150_v53 = vpop.eup %2149  ;;  %v1629_v18 = vmul.f32 %v2148_v14, %v2731_v15  ;;  %2169 = vrcp.f32 %v1595_v32  ;;  %v1460_v24 = vsel %vm1458_vm15, %v1459_v8, %v1457_v1  ;;  %v1473_v15 = vand.u32 2147483648, %v2905_v37  ;;  %v3026_v23 = vpop.xlane.xlu1 %1346 }
 0x39a   : > { %v2152_v30 = vpop.eup %2151  ;;  %1685 = vst [vmem:[#allocation4 + $0x48] sm:$0xff] %v1631_v44  ;;  %v1594_v9 = vmax.f32 %v1460_v24, 1e-12  ;;  %v1476_v43 = vmul.f32 %v2150_v53, %v2903_v12  ;;  %2171 = vrsqrt.f32 %v2963_v17  ;;  %v1508_v44 = vand.u32 2147483648, %v2942_v4 }
 0x39b   : > { %1684 = vst [vmem:[#allocation4 + $0x40] sm:$0xff] %v1629_v18  ;;  %v1469_v6 = vmul.f32 %v2152_v30, %v2905_v37  ;;  %2173 = vrsqrt.f32 %v2981_v7  ;;  %vm1519_vm12 = vcmp.eq.f32.partialorder %v2963_v17, inf  ;;  %vm1521_vm13 = vcmp.eq.f32.partialorder %v2963_v17, 0.0 }
 0x39c   : > { %v2154_v59 = vpop.eup %2153  ;;  %2175 = vrcp.f32 %v1594_v9  ;;  %v1478_v46 = vsel %vm1477_vm0, %v2903_v12, %v1476_v43  ;;  %v3039_v8 = vpop.xlane.xlu0 %1344  ;;  %vm1512_vm14 = vcmp.eq.f32.partialorder %v2981_v7, inf  ;;  %vm1514_vm15 = vcmp.eq.f32.partialorder %v2981_v7, 0.0 }
 0x39d   : > { %v2156_v3 = vpop.eup %2155  ;;  %v1481_v25 = vsel %vm1479_vm1, %v1480_v20, %v1478_v46  ;;  %v1471_v57 = vsel %vm1470_vm2, %v2905_v37, %v1469_v6  ;;  %v1490_v0 = vmul.f32 %v2154_v59, %v2921_v29  ;;  %2177 = vrsqrt.f32 %v2995_v61  ;;  %v3053_v30 = vpop.xlane.xlu1 %1350 }
 0x39e   : > { %v2158_v63 = vpop.eup %2157  ;;  %v1635_v33 = vmul.f32 %v2156_v3, %v2737_v16  ;;  %v1597_v19 = vmax.f32 %v1481_v25, 1e-12  ;;  %v1474_v40 = vsel %vm1472_vm3, %v1473_v15, %v1471_v57  ;;  %vm1533_vm0 = vcmp.eq.f32.partialorder %v2995_v61, inf }
 0x39f   : > { %v2160_v12 = vpop.eup %2159  ;;  %v1633_v56 = vmul.f32 %v2158_v63, %v2739_v42  ;;  %v1596_v58 = vmax.f32 %v1474_v40, 1e-12  ;;  %v1492_v49 = vsel %vm1491_vm4, %v2921_v29, %v1490_v0  ;;  %v1515_v40 = vand.u32 2147483648, %v2981_v7 }
 0x3a0   : > { %v2162_v13 = vpop.eup %2161  ;;  %1687 = vst [vmem:[#allocation4 + $0x58] sm:$0xff] %v1635_v33  ;;  %2179 = vrcp.f32 %v1597_v19  ;;  %v1495_v16 = vsel %vm1493_vm5, %v1494_v55, %v1492_v49  ;;  %v1483_v37 = vmul.f32 %v2160_v12, %v2923_v60  ;;  %v3063_v3 = vpop.xlane.xlu0 %1348  ;;  %vm1535_vm1 = vcmp.eq.f32.partialorder %v2995_v61, 0.0 }
 0x3a1   : > { %v2164_v11 = vpop.eup %2163  ;;  %1686 = vst [vmem:[#allocation4 + $0x50] sm:$0xff] %v1633_v56  ;;  %2181 = vrcp.f32 %v1596_v58  ;;  %v1599_v42 = vmax.f32 %v1495_v16, 1e-12  ;;  %v1504_v32 = vmul.f32 %v2162_v13, %v2942_v4  ;;  %v3077_v12 = vpop.xlane.xlu1 %1354  ;;  %vm1526_vm2 = vcmp.eq.f32.partialorder %v3008_v48, inf }
 0x3a2   : > { %v1639_v14 = vmul.f32 %v2164_v11, %v2745_v21  ;;  %v1485_v29 = vsel %vm1484_vm6, %v2923_v60, %v1483_v37  ;;  %2183 = vrsqrt.f32 %v3008_v48  ;;  %v2166_v1 = vpop.eup %2165  ;;  %v1501_v60 = vand.u32 2147483648, %v2949_v51 }
 0x3a3   : > { %2185 = vrcp.f32 %v1599_v42  ;;  %v1488_v20 = vsel %vm1486_vm7, %v1487_v5, %v1485_v29  ;;  %v1506_v53 = vsel %vm1505_vm8, %v2942_v4, %v1504_v32  ;;  %v1497_v24 = vmul.f32 %v2166_v1, %v2949_v51 }
 0x3a4   : > { %1689 = vst [vmem:[#allocation4 + $0x68] sm:$0xff] %v1639_v14  ;;  %v1598_v18 = vmax.f32 %v1488_v20, 1e-12  ;;  %v1509_v21 = vsel %vm1507_vm9, %v1508_v44, %v1506_v53  ;;  %2187 = vrsqrt.f32 %v3026_v23  ;;  %vm1528_vm3 = vcmp.eq.f32.partialorder %v3008_v48, 0.0 }
 0x3a5   : > { %v2168_v9 = vpop.eup %2167  ;;  %v1601_v43 = vmax.f32 %v1509_v21, 1e-12  ;;  %2189 = vrsqrt.f32 %v3039_v8  ;;  %v1499_v15 = vsel %vm1498_vm10, %v2949_v51, %v1497_v24  ;;  %v1522_v51 = vand.u32 2147483648, %v2963_v17 }
 0x3a6   : > { %v2170_v6 = vpop.eup %2169  ;;  %v1637_v4 = vmul.f32 %v2168_v9, %v2747_v22  ;;  %2191 = vrcp.f32 %v1598_v18  ;;  %v1502_v55 = vsel %vm1500_vm11, %v1501_v60, %v1499_v15  ;;  %vm1547_vm4 = vcmp.eq.f32.partialorder %v3026_v23, inf }
 0x3a7   : > { %v2172_v59 = vpop.eup %2171  ;;  %v1643_v46 = vmul.f32 %v2170_v6, %v2753_v27  ;;  %2193 = vrcp.f32 %v1601_v43  ;;  %v1600_v57 = vmax.f32 %v1502_v55, 1e-12  ;;  %vm1549_vm5 = vcmp.eq.f32.partialorder %v3026_v23, 0.0 }
 0x3a8   : > { %v2174_v25 = vpop.eup %2173  ;;  %1688 = vst [vmem:[#allocation4 + $0x60] sm:$0xff] %v1637_v4  ;;  %v1518_v0 = vmul.f32 %v2172_v59, %v2963_v17  ;;  %2195 = vrsqrt.f32 %v3053_v30  ;;  %v1550_v43 = vand.u32 2147483648, %v3026_v23  ;;  %vm1540_vm6 = vcmp.eq.f32.partialorder %v3039_v8, inf }
 0x3a9   : > { %v2176_v22 = vpop.eup %2175  ;;  %1691 = vst [vmem:[#allocation4 + $0x78] sm:$0xff] %v1643_v46  ;;  %v1511_v27 = vmul.f32 %v2174_v25, %v2981_v7  ;;  %2197 = vrcp.f32 %v1600_v57  ;;  %v1543_v15 = vand.u32 2147483648, %v3039_v8  ;;  %vm1542_vm7 = vcmp.eq.f32.partialorder %v3039_v8, 0.0 }
 0x3aa   : > { %v2178_v63 = vpop.eup %2177  ;;  %v1641_v33 = vmul.f32 %v2176_v22, %v2755_v28  ;;  %v1520_v19 = vsel %vm1519_vm12, %v2963_v17, %v1518_v0  ;;  %2199 = vrsqrt.f32 %v3063_v3  ;;  %v1536_v28 = vand.u32 2147483648, %v2995_v61 }
 0x3ab   : > { %v1523_v56 = vsel %vm1521_vm13, %v1522_v51, %v1520_v19  ;;  %v1513_v58 = vsel %vm1512_vm14, %v2981_v7, %v1511_v27  ;;  %v1532_v49 = vmul.f32 %v2178_v63, %v2995_v61  ;;  %2201 = vrsqrt.f32 %v3077_v12  ;;  %v3087_v7 = vpop.xlane.xlu0 %1352 }
 0x3ac   : > { %1690 = vst [vmem:[#allocation4 + $0x70] sm:$0xff] %v1641_v33  ;;  %v1603_v13 = vmax.f32 %v1523_v56, 1e-12  ;;  %v1516_v16 = vsel %vm1514_vm15, %v1515_v40, %v1513_v58  ;;  %vm1561_vm8 = vcmp.eq.f32.partialorder %v3053_v30, inf  ;;  %vm1563_vm9 = vcmp.eq.f32.partialorder %v3053_v30, 0.0 }
 0x3ad   : > { %v2180_v37 = vpop.eup %2179  ;;  %v1602_v17 = vmax.f32 %v1516_v16, 1e-12  ;;  %v1534_v5 = vsel %vm1533_vm0, %v2995_v61, %v1532_v49  ;;  %vm1554_vm10 = vcmp.eq.f32.partialorder %v3063_v3, inf  ;;  %v1557_v56 = vand.u32 2147483648, %v3063_v3 }
 0x3ae   : > { %v2182_v11 = vpop.eup %2181  ;;  %v1647_v42 = vmul.f32 %v2180_v37, %v2761_v31  ;;  %2203 = vrcp.f32 %v1603_v13  ;;  %v1537_v32 = vsel %vm1535_vm1, %v1536_v28, %v1534_v5  ;;  %v1529_v31 = vand.u32 2147483648, %v3008_v48 }
 0x3af   : > { %v2184_v14 = vpop.eup %2183  ;;  %v1645_v29 = vmul.f32 %v2182_v11, %v2763_v52  ;;  %2205 = vrcp.f32 %v1602_v17  ;;  %v1605_v44 = vmax.f32 %v1537_v32, 1e-12  ;;  %vm1556_vm11 = vcmp.eq.f32.partialorder %v3063_v3, 0.0 }
 0x3b0   : > { %v2186_v1 = vpop.eup %2185  ;;  %1693 = vst [vmem:[#allocation4 + $0x88] sm:$0xff] %v1647_v42  ;;  %v1525_v20 = vmul.f32 %v2184_v14, %v3008_v48  ;;  %2207 = vrsqrt.f32 %v3087_v7  ;;  %vm1575_vm12 = vcmp.eq.f32.partialorder %v3077_v12, inf  ;;  %v1578_v28 = vand.u32 2147483648, %v3077_v12 }
 0x3b1   : > { %v2188_v61 = vpop.eup %2187  ;;  %1692 = vst [vmem:[#allocation4 + $0x80] sm:$0xff] %v1645_v29  ;;  %v1651_v53 = vmul.f32 %v2186_v1, %v2769_v35  ;;  %2209 = vrcp.f32 %v1605_v44  ;;  %vm1577_vm13 = vcmp.eq.f32.partialorder %v3077_v12, 0.0  ;;  %vm1568_vm14 = vcmp.eq.f32.partialorder %v3087_v7, inf }
 0x3b2   : > { %v2190_v52 = vpop.eup %2189  ;;  %v1527_v18 = vsel %vm1526_vm2, %v3008_v48, %v1525_v20  ;;  %v1546_v21 = vmul.f32 %v2188_v61, %v3026_v23  ;;  %v1571_v29 = vand.u32 2147483648, %v3087_v7  ;;  %vm1570_vm15 = vcmp.eq.f32.partialorder %v3087_v7, 0.0 }
 0x3b3   : > { %v2192_v24 = vpop.eup %2191  ;;  %1695 = vst [vmem:[#allocation4 + $0x98] sm:$0xff] %v1651_v53  ;;  %v1530_v9 = vsel %vm1528_vm3, %v1529_v31, %v1527_v18  ;;  %v1539_v35 = vmul.f32 %v2190_v52, %v3039_v8 }
 0x3b4   : > { %v2194_v60 = vpop.eup %2193  ;;  %v1649_v6 = vmul.f32 %v2192_v24, %v2771_v50  ;;  %v1604_v4 = vmax.f32 %v1530_v9, 1e-12  ;;  %v1548_v48 = vsel %vm1547_vm4, %v3026_v23, %v1546_v21  ;;  %v1564_v23 = vand.u32 2147483648, %v3053_v30 }
 0x3b5   : > { %v2196_v59 = vpop.eup %2195  ;;  %v1655_v46 = vmul.f32 %v2194_v60, %v2777_v62  ;;  %v1551_v55 = vsel %vm1549_vm5, %v1550_v43, %v1548_v48  ;;  %v1541_v25 = vsel %vm1540_vm6, %v3039_v8, %v1539_v35 }
 0x3b6   : > { %1694 = vst [vmem:[#allocation4 + $0x90] sm:$0xff] %v1649_v6  ;;  %2211 = vrcp.f32 %v1604_v4  ;;  %v1607_v57 = vmax.f32 %v1551_v55, 1e-12  ;;  %v1544_v0 = vsel %vm1542_vm7, %v1543_v15, %v1541_v25  ;;  %v1560_v22 = vmul.f32 %v2196_v59, %v3053_v30  ;;  %v2198_v50 = vpop.eup %2197 }
 0x3b7   : > { %1697 = vst [vmem:[#allocation4 + $0xa8] sm:$0xff] %v1655_v46  ;;  %v1606_v51 = vmax.f32 %v1544_v0, 1e-12  ;;  %v2200_v27 = vpop.eup %2199  ;;  %v1653_v62 = vmul.f32 %v2198_v50, %v2779_v2 }
 0x3b8   : > { %2213 = vrcp.f32 %v1607_v57  ;;  %v1562_v63 = vsel %vm1561_vm8, %v3053_v30, %v1560_v22  ;;  %v1553_v33 = vmul.f32 %v2200_v27, %v3063_v3  ;;  %v2202_v19 = vpop.eup %2201 }
 0x3b9   : > { %2215 = vrcp.f32 %v1606_v51  ;;  %v1565_v8 = vsel %vm1563_vm9, %v1564_v23, %v1562_v63  ;;  %1696 = vst [vmem:[#allocation4 + $0xa0] sm:$0xff] %v1653_v62  ;;  %v1574_v2 = vmul.f32 %v2202_v19, %v3077_v12 }
 0x3ba   : > { %v1609_v40 = vmax.f32 %v1565_v8, 1e-12  ;;  %v1555_v49 = vsel %vm1554_vm10, %v3063_v3, %v1553_v33 }
 0x3bb   : > { %v2204_v58 = vpop.eup %2203  ;;  %v1558_v16 = vsel %vm1556_vm11, %v1557_v56, %v1555_v49  ;;  %v1576_v11 = vsel %vm1575_vm12, %v3077_v12, %v1574_v2 }
 0x3bc   : > { %v2206_v30 = vpop.eup %2205  ;;  %v1659_v13 = vmul.f32 %v2204_v58, %v2785_v38  ;;  %2217 = vrcp.f32 %v1609_v40  ;;  %v1608_v5 = vmax.f32 %v1558_v16, 1e-12  ;;  %v1579_v42 = vsel %vm1577_vm13, %v1578_v28, %v1576_v11 }
 0x3bd   : > { %v2208_v37 = vpop.eup %2207  ;;  %v1657_v17 = vmul.f32 %v2206_v30, %v2787_v39  ;;  %v1611_v14 = vmax.f32 %v1579_v42, 1e-12 }
 0x3be   : > { %v2210_v3 = vpop.eup %2209  ;;  %1699 = vst [vmem:[#allocation4 + $0xb8] sm:$0xff] %v1659_v13  ;;  %v1567_v32 = vmul.f32 %v2208_v37, %v3087_v7  ;;  %2219 = vrcp.f32 %v1608_v5 }
 0x3bf   : > { %1698 = vst [vmem:[#allocation4 + $0xb0] sm:$0xff] %v1657_v17  ;;  %v1663_v38 = vmul.f32 %v2210_v3, %v2793_v10  ;;  %2221 = vrcp.f32 %v1611_v14 }
 0x3c0   : > { %v1569_v39 = vsel %vm1568_vm14, %v3087_v7, %v1567_v32 }
 0x3c1   : > { %1701 = vst [vmem:[#allocation4 + $0xc8] sm:$0xff] %v1663_v38  ;;  %v1572_v12 = vsel %vm1570_vm15, %v1571_v29, %v1569_v39 }
 0x3c2   : > { %v1610_v44 = vmax.f32 %v1572_v12, 1e-12 }
 0x3c3   : > { %v2212_v1 = vpop.eup %2211 }
 0x3c4   : > { %v1661_v20 = vmul.f32 %v2212_v1, %v2795_v45  ;;  %2223 = vrcp.f32 %v1610_v44 }
 0x3c5   : > { %v2214_v61 = vpop.eup %2213 }
 0x3c6   : > { %v2216_v53 = vpop.eup %2215  ;;  %1700 = vst [vmem:[#allocation4 + $0xc0] sm:$0xff] %v1661_v20  ;;  %v1667_v10 = vmul.f32 %v2214_v61, %v2801_v47 }
 0x3c7   : > { %v1665_v31 = vmul.f32 %v2216_v53, %v2803_v26 }
 0x3c8   : > { %1703 = vst [vmem:[#allocation4 + $0xd8] sm:$0xff] %v1667_v10 }
 0x3c9   : > { %v2218_v52 = vpop.eup %2217  ;;  %1702 = vst [vmem:[#allocation4 + $0xd0] sm:$0xff] %v1665_v31 }
 0x3ca   : > { %v1671_v7 = vmul.f32 %v2218_v52, %v2809_v34 }
 0x3cb   : > { %v2220_v18 = vpop.eup %2219 }
 0x3cc   : > { %1705 = vst [vmem:[#allocation4 + $0xe8] sm:$0xff] %v1671_v7  ;;  %v1669_v21 = vmul.f32 %v2220_v18, %v2811_v36  ;;  %v2222_v24 = vpop.eup %2221 }
 0x3cd   : > { %v1675_v45 = vmul.f32 %v2222_v24, %v2817_v54 }
 0x3ce   : > { %1704 = vst [vmem:[#allocation4 + $0xe0] sm:$0xff] %v1669_v21 }
 0x3cf   : > { %1707 = vst [vmem:[#allocation4 + $0xf8] sm:$0xff] %v1675_v45 }
 0x3d1   : > { %v2224_v9 = vpop.eup %2223 }
 0x3d2   : > { %v1673_v43 = vmul.f32 %v2224_v9, %v2819_v41 }
 0x3d4   : > { %1706 = vst [vmem:[#allocation4 + $0xf0] sm:$0xff] %v1673_v43 }
 0x3d5 PF: > { %p2028_p10 = scmp.eq.s32.totalorder %s2295_s16, 3  ;;  %s2261_s17 = smov [#allocation4]  }
 0x3d6   : > { %s1714_s21 = sshll.u32 %s2261_s17, 4  ;;  %s1715_s21 = int_to_ptr.vmem [resolvable:$true] %s1714_s21 }
 0x3d7   : > { %s2225_s30 = scalar_lea.vmem %s1715_s21, 4096  ;;  %p2232_p0 = scmp.lt.s32.totalorder %s1715_s21, %s1715_s21 }
 0x3d8   : > { %p2226_p11 = scmp.ne.s32.totalorder %s1715_s21, %s2225_s30  ;;  %p2233_p1 = scmp.lt.s32.totalorder %s2225_s30, %s2225_s30 }
 0x3da   : > { %p2227_p12 = pnand %p2226_p11, %p2028_p10  ;;  %p2234_p2 = por %p2233_p1, %p2232_p0 }
 0x3dc   : > { %p2228_p13 = pneg %p2227_p12 }
 0x3de   : > { %p2235_p3 = pnand %p2234_p2, %p2228_p13 }
 0x3e0   : > { %2238 = shalt.err (!%p2235_p3)
}
 0x3e1   : > { %s2262_s5 = smov 128   ;;  %s2263_s6 = smov 8  }
 0x3e2   : > { %2025 = dma.vmem_to_hbm [thread:$0]  (%p2028_p10), %s1715_s21, 4096, %s3160_s4, [#allocation5], %s2262_s5, %s2262_s5, %s2263_s6  }
 0x3e3   : > { %2254 = dma.done.wait (%p2028_p10), [#allocation5], 4096  }
 0x3e4   : > { %2256 = vsyncadd (%p2028_p10), [#allocation5], 4294963200 }
 0x3e5 PF: > { %s15_s15 = sadd.s32 1, %s2259_s15  }
 0x3e6   : > { %p12_p4 = scmp.ge.s32.totalorder %s15_s15, 6  }
 0x3e8   :  { %14 = sbr.rel (!%p12_p4) target bundleno = 1 (0x1), region = 82 }
 0x3ed   :  { %1730 = vsyncpa [#allocation5], 1 }
 0x3ee   :  { %1732 = vsyncpa [#allocation5 + $0x1], 1 }

</bundles_post_ra>
